<compile_context>
chip_gen: v5e
topology: v5e:2x2
jax: 0.10.0
libtpu: 0.0.40
codegen_flags: <defaults>
</compile_context>

<pallas_src>
import jax
import jax.numpy as jnp
from jax.experimental import pallas as pl
from jax.experimental.pallas import tpu as pltpu

_LANE = 128
_SUB = 8
_BN_EPS = 1e-5


def _round_up(x, m):
    return (x + m - 1) // m * m


# --------------------------------------------------------------------------
# Parameter folding + packing (done once, outside the hot path)
# --------------------------------------------------------------------------
def pack_params(params, dim, reduction_ratio=4, pos_dim=3):
    """Fold + pack all parameters into one (rows, 128) f32 buffer.

    Folds (free at pack time, exact up to f32 rounding):
      * pos_encoder[0] / pos_gate[0] / deform_offset[0] fused along the output
        axis -> one (pos_dim, hid + 2*dim) matmul in-kernel.
      * channel_attn[0] acting on cat([enhanced, pos_code]) is rewritten so the
        runtime lane-concat AND the pos_encoder second matmul disappear:
            z = (feat*(gate+offset)) @ A + h @ (w_pe2 @ (A+B))
                + (b_pe2 @ (A+B) + b_c1),   A = w_c1[:dim], B = w_c1[dim:].
    Row offsets are sublane(8)-aligned so in-kernel slices stay tile-aligned.
    """
    hid = dim // 2
    red = dim // reduction_ratio

    w_pos = jnp.concatenate([params["w_pe1"], params["w_g"], params["w_o"]], axis=1)
    b_pos = jnp.concatenate([params["b_pe1"], params["b_g"], params["b_o"]], axis=1)

    a = params["w_c1"][:dim]                        # acts on enhanced
    ab = a + params["w_c1"][dim:]                   # acts on pos_code (folded)
    w_fold = params["w_pe2"] @ ab                   # (hid, red)
    b_z = params["b_pe2"] @ ab + params["b_c1"]     # (1, red)

    tensors = {
        "w_pos": w_pos, "b_pos": b_pos,
        "w_c1a": a, "w_fold": w_fold, "b_z": b_z,
        "bn_g": params["bn_g"], "bn_b": params["bn_b"],
        "w_c2": params["w_c2"], "b_c2": params["b_c2"],
    }

    lane = _round_up(max(t.shape[1] for t in tensors.values()), _LANE)
    blocks, offsets, row = [], {}, 0
    for name, t in tensors.items():
        nr, nc = t.shape
        pr = _round_up(nr, _SUB)
        blk = jnp.zeros((pr, lane), jnp.float32).at[:nr, :nc].set(
            t.astype(jnp.float32))
        blocks.append(blk)
        offsets[name] = row
        row += pr
    packed = jnp.concatenate(blocks, axis=0)

    meta = dict(dim=dim, hid=hid, red=red, pos_dim=pos_dim,
                lane=lane, rows=row, offsets=offsets)
    return packed, meta


# --------------------------------------------------------------------------
# Kernel-side helpers (static ref slices / shared math)
# --------------------------------------------------------------------------
def _unpack_common(p_ref, meta):
    dim, hid, red, pos_dim = meta["dim"], meta["hid"], meta["red"], meta["pos_dim"]
    o = meta["offsets"]
    pw = hid + 2 * dim
    w_pos = p_ref[o["w_pos"]:o["w_pos"] + pos_dim, 0:pw]
    b_pos = p_ref[o["b_pos"]:o["b_pos"] + 1, 0:pw]
    w_c1a = p_ref[o["w_c1a"]:o["w_c1a"] + dim, 0:red]
    w_fold = p_ref[o["w_fold"]:o["w_fold"] + hid, 0:red]
    b_z = p_ref[o["b_z"]:o["b_z"] + 1, 0:red]
    return w_pos, b_pos, w_c1a, w_fold, b_z


def _compute_z(feat, pos, w_pos, b_pos, w_c1a, w_fold, b_z, hid, dim):
    # One fused MXU push for pos_encoder[0] / pos_gate / deform_offset.
    pos_all = jnp.dot(pos, w_pos, preferred_element_type=jnp.float32) + b_pos
    h = jnp.maximum(pos_all[:, 0:hid], 0.0)                    # pos_encoder hidden
    gate = jax.nn.sigmoid(pos_all[:, hid:hid + dim])           # pos_gate
    offset = jnp.tanh(pos_all[:, hid + dim:hid + 2 * dim])     # deform_offset
    fg = feat * (gate + offset)
    # Folded channel_attn[0]: no concat, no pos_encoder second matmul.
    z = (jnp.dot(fg, w_c1a, preferred_element_type=jnp.float32)
         + jnp.dot(h, w_fold, preferred_element_type=jnp.float32)
         + b_z)
    return z


# --------------------------------------------------------------------------
# Pass 1: BatchNorm batch statistics over all N-tiles ("arbitrary" grid axis)
# --------------------------------------------------------------------------
def _make_stats_kernel(meta, block_n, n_true, n_pad):
    dim, hid, red = meta["dim"], meta["hid"], meta["red"]
    o = meta["offsets"]
    inv_n = 1.0 / float(n_true)
    needs_mask = (n_pad != n_true)

    def kernel(feat_ref, pos_ref, p_ref, affine_ref, sum_ref, sumsq_ref):
        i = pl.program_id(0)

        @pl.when(i == 0)
        def _():
            sum_ref[...] = jnp.zeros_like(sum_ref)
            sumsq_ref[...] = jnp.zeros_like(sumsq_ref)

        feat = feat_ref[...].astype(jnp.float32)
        pos = pos_ref[...].astype(jnp.float32)
        w_pos, b_pos, w_c1a, w_fold, b_z = _unpack_common(p_ref, meta)

        z = _compute_z(feat, pos, w_pos, b_pos, w_c1a, w_fold, b_z, hid, dim)

        if needs_mask:  # zero out padded tail rows so they don't bias BN stats
            rows = (jax.lax.broadcasted_iota(jnp.int32, (block_n, 1), 0)
                    + i * block_n)
            z = jnp.where(rows < n_true, z, 0.0)

        sum_ref[...] += jnp.sum(z, axis=0, keepdims=True)
        sumsq_ref[...] += jnp.sum(z * z, axis=0, keepdims=True)

        @pl.when(i == pl.num_programs(0) - 1)
        def _():
            bn_g = p_ref[o["bn_g"]:o["bn_g"] + 1, 0:red]
            bn_b = p_ref[o["bn_b"]:o["bn_b"] + 1, 0:red]
            mean = sum_ref[...] * inv_n
            var = sumsq_ref[...] * inv_n - mean * mean    # biased (train-mode) var
            scale = jax.lax.rsqrt(var + _BN_EPS) * bn_g   # BN affine folded in
            shift = bn_b - mean * scale
            affine_ref[0:1, :] = scale
            affine_ref[1:2, :] = shift

    return kernel


# --------------------------------------------------------------------------
# Pass 2: normalize + channel attention + output ("parallel" grid axis)
# --------------------------------------------------------------------------
def _make_apply_kernel(meta):
    dim, hid, red = meta["dim"], meta["hid"], meta["red"]
    o = meta["offsets"]

    def kernel(feat_ref, pos_ref, p_ref, affine_ref, out_ref):
        feat = feat_ref[...].astype(jnp.float32)
        pos = pos_ref[...].astype(jnp.float32)
        w_pos, b_pos, w_c1a, w_fold, b_z = _unpack_common(p_ref, meta)
        w_c2 = p_ref[o["w_c2"]:o["w_c2"] + red, 0:dim]
        b_c2 = p_ref[o["b_c2"]:o["b_c2"] + 1, 0:dim]

        z = _compute_z(feat, pos, w_pos, b_pos, w_c1a, w_fold, b_z, hid, dim)

        # BatchNorm (folded scale/shift from pass 1) + ReLU
        zn = jnp.maximum(z * affine_ref[0:1, :] + affine_ref[1:2, :], 0.0)
        channel_weights = jax.nn.sigmoid(
            jnp.dot(zn, w_c2, preferred_element_type=jnp.float32) + b_c2)

        # TODO(synk): dim=32 < 128 lanes -> masked stores; fold 4 independent
        # dim-32 groups into a 128-lane slab if the surrounding model permits.
        out_ref[...] = (feat * channel_weights).astype(out_ref.dtype)

    return kernel


# --------------------------------------------------------------------------
# Wrapper
# --------------------------------------------------------------------------
def enhanced_channel_attention(feat, pos, packed, meta, *, block_n=1024):
    """Forward pass of EnhancedChannelAttention as two tiled Pallas calls."""
    n, dim = feat.shape
    hid, red, pos_dim = meta["hid"], meta["red"], meta["pos_dim"]
    rows, lane = meta["rows"], meta["lane"]
    assert dim == meta["dim"] and pos.shape == (n, pos_dim)

    bn = _round_up(min(block_n, _round_up(n, _SUB)), _SUB)
    n_pad = _round_up(n, bn)
    num_blocks = n_pad // bn
    if n_pad != n:
        # TODO(synk): for very large ragged N, mask the tail in-kernel instead
        # of materializing padded copies of feat/pos in HBM.
        feat_p = jnp.zeros((n_pad, dim), feat.dtype).at[:n].set(feat)
        pos_p = jnp.zeros((n_pad, pos_dim), pos.dtype).at[:n].set(pos)
    else:
        feat_p, pos_p = feat, pos

    feat_spec = pl.BlockSpec((bn, dim), lambda i: (i, 0))
    pos_spec = pl.BlockSpec((bn, pos_dim), lambda i: (i, 0))
    # Parameter slab: constant block index -> DMA'd once, resident across tiles.
    par_spec = pl.BlockSpec((rows, lane), lambda i: (0, 0))
    aff_spec = pl.BlockSpec((2, red), lambda i: (0, 0))

    matmul_flops = 2 * n_pad * (pos_dim * (hid + 2 * dim) + dim * red + hid * red)
    io_bytes = (feat_p.size * feat_p.dtype.itemsize
                + pos_p.size * pos_p.dtype.itemsize)
    param_bytes = packed.size * 4
    vmem_limit = 32 * 1024 * 1024  # headroom, sized against v7x's 64 MiB VMEM

    # ---- pass 1: batch statistics (sequential accumulation over N-tiles) ----
    affine = pl.pallas_call(
        _make_stats_kernel(meta, bn, n, n_pad),
        out_shape=jax.ShapeDtypeStruct((2, red), jnp.float32),
        grid=(num_blocks,),
        in_specs=[feat_spec, pos_spec, par_spec],
        out_specs=aff_spec,
        scratch_shapes=[pltpu.VMEM((1, red), jnp.float32),
                        pltpu.VMEM((1, red), jnp.float32)],
        compiler_params=pltpu.CompilerParams(
            dimension_semantics=("arbitrary",),
            vmem_limit_bytes=vmem_limit),
        cost_estimate=pl.CostEstimate(
            flops=matmul_flops,
            transcendentals=2 * n_pad * dim,
            bytes_accessed=io_bytes + param_bytes),
    )(feat_p, pos_p, packed)

    # ---- pass 2: normalize + attention + output (independent N-tiles) -------
    out = pl.pallas_call(
        _make_apply_kernel(meta),
        out_shape=jax.ShapeDtypeStruct((n_pad, dim), feat.dtype),
        grid=(num_blocks,),
        in_specs=[feat_spec, pos_spec, par_spec, aff_spec],
        out_specs=feat_spec,
        compiler_params=pltpu.CompilerParams(
            dimension_semantics=("parallel",),   # v7x: split across both TCs
            vmem_limit_bytes=vmem_limit),
        cost_estimate=pl.CostEstimate(
            flops=matmul_flops + 2 * n_pad * red * dim,
            transcendentals=3 * n_pad * dim,
            bytes_accessed=2 * io_bytes + param_bytes),
    )(feat_p, pos_p, packed, affine)

    return out[:n] if n_pad != n else out


# --------------------------------------------------------------------------
# Init + pure-JAX reference (mirrors the PyTorch forward exactly)
# --------------------------------------------------------------------------
def _linear_params(key, fan_in, fan_out):
    # PyTorch nn.Linear default init: U(-1/sqrt(fan_in), 1/sqrt(fan_in)).
    kw, kb = jax.random.split(key)
    bound = 1.0 / jnp.sqrt(fan_in)
    w = jax.random.uniform(kw, (fan_in, fan_out), jnp.float32, -bound, bound)
    b = jax.random.uniform(kb, (1, fan_out), jnp.float32, -bound, bound)
    return w, b


def init_params(key, dim, reduction_ratio=4, pos_dim=3):
    keys = jax.random.split(key, 6)
    hid = dim // 2
    red = dim // reduction_ratio

    w_pe1, b_pe1 = _linear_params(keys[0], pos_dim, hid)
    w_pe2, b_pe2 = _linear_params(keys[1], hid, dim)
    w_g, b_g = _linear_params(keys[2], pos_dim, dim)
    w_o, b_o = _linear_params(keys[3], pos_dim, dim)
    w_c1, b_c1 = _linear_params(keys[4], 2 * dim, red)
    w_c2, b_c2 = _linear_params(keys[5], red, dim)

    return {
        "w_pe1": w_pe1, "b_pe1": b_pe1,
        "w_pe2": w_pe2, "b_pe2": b_pe2,
        "w_g": w_g, "b_g": b_g,
        "w_o": w_o, "b_o": b_o,
        "w_c1": w_c1, "b_c1": b_c1,
        "bn_g": jnp.ones((1, red), jnp.float32),
        "bn_b": jnp.zeros((1, red), jnp.float32),
        "w_c2": w_c2, "b_c2": b_c2,
    }


def _reference(feat, pos, p):
    h = jnp.maximum(pos @ p["w_pe1"] + p["b_pe1"], 0.0)
    pos_code = h @ p["w_pe2"] + p["b_pe2"]
    gate = jax.nn.sigmoid(pos @ p["w_g"] + p["b_g"])
    offset = jnp.tanh(pos @ p["w_o"] + p["b_o"])
    enhanced = feat * (gate + offset) + pos_code
    combined = jnp.concatenate([enhanced, pos_code], axis=1)
    z = combined @ p["w_c1"] + p["b_c1"]
    mean = jnp.mean(z, axis=0, keepdims=True)
    var = jnp.mean((z - mean) ** 2, axis=0, keepdims=True)   # train-mode BN
    z = (z - mean) / jnp.sqrt(var + _BN_EPS) * p["bn_g"] + p["bn_b"]
    z = jnp.maximum(z, 0.0)
    cw = jax.nn.sigmoid(z @ p["w_c2"] + p["b_c2"])
    return feat * cw


if __name__ == "__main__":
    N, DIM, POS_DIM, RED = 300, 32, 3, 4
    BLOCK_N = 128   # small tile so the demo exercises multi-tile BN + tail mask

    key = jax.random.PRNGKey(0)
    k_feat, k_pos, k_params = jax.random.split(key, 3)
    feat = jax.random.normal(k_feat, (N, DIM), jnp.float32)
    pos = jax.random.normal(k_pos, (N, POS_DIM), jnp.float32)
    params = init_params(k_params, DIM, reduction_ratio=RED, pos_dim=POS_DIM)

    ref = _reference(feat, pos, params)

    packed, meta = pack_params(params, DIM, reduction_ratio=RED, pos_dim=POS_DIM)

    # f32 I/O (default), multi-tile path with padded tail.
    out = enhanced_channel_attention(feat, pos, packed, meta, block_n=BLOCK_N)
    out = jax.block_until_ready(out)
    assert out.shape == (N, DIM)
    assert jnp.allclose(out, ref, atol=1e-4, rtol=1e-4), \
        float(jnp.max(jnp.abs(out - ref)))

    # bf16 I/O smoke test (compute stays f32 in-kernel; main byte lever on v6e/v7x).
    out_bf16 = enhanced_channel_attention(
        feat.astype(jnp.bfloat16), pos.astype(jnp.bfloat16), packed, meta,
        block_n=BLOCK_N)
    out_bf16 = jax.block_until_ready(out_bf16)
    assert out_bf16.dtype == jnp.bfloat16
    assert jnp.allclose(out_bf16.astype(jnp.float32), ref, atol=0.1, rtol=0.1)

    print("KERNEL_OK")
</pallas_src>

<mosaic_0001>
module attributes {stable_mosaic.version = 11 : i64} {
  func.func @kernel(%arg0: i32, %arg1: memref<128x32xf32, #tpu.memory_space<vmem>>, %arg2: memref<128x3xf32, #tpu.memory_space<vmem>>, %arg3: memref<104x128xf32, #tpu.memory_space<vmem>>, %arg4: memref<2x8xf32, #tpu.memory_space<vmem>>, %arg5: memref<1x8xf32, #tpu.memory_space<vmem>>, %arg6: memref<1x8xf32, #tpu.memory_space<vmem>>) attributes {dimension_semantics = [#tpu.dimension_semantics<arbitrary>], iteration_bounds = array<i64: 3>, scalar_prefetch = 0 : i64, scratch_operands = 2 : i64, tpu.core_type = #tpu.core_type<tc>, window_params = [{transform_indices = @transform_0, window_bounds = array<i64: 128, 32>}, {transform_indices = @transform_1, window_bounds = array<i64: 128, 3>}, {pipeline_mode = #tpu.pipeline_mode<synchronous>, transform_indices = @transform_2, window_bounds = array<i64: 104, 128>}, {pipeline_mode = #tpu.pipeline_mode<synchronous>, transform_indices = @transform_3, window_bounds = array<i64: 2, 8>}]} {
    %c0_i32 = arith.constant 0 : i32
    %0 = arith.cmpi eq, %arg0, %c0_i32 : i32
    %1 = arith.extui %0 : i1 to i32
    %c0_i32_0 = arith.constant 0 : i32
    %2 = arith.cmpi ne, %1, %c0_i32_0 : i32
    scf.if %2 {
      %cst_26 = arith.constant 0.000000e+00 : f32
      %55 = vector.broadcast %cst_26 : f32 to vector<1x8xf32>
      %c0_27 = arith.constant 0 : index
      %c0_28 = arith.constant 0 : index
      %56 = vector.load %arg5[%c0_27, %c0_28] : memref<1x8xf32, #tpu.memory_space<vmem>>, vector<1x8xf32>
      tpu.vector_store %arg5[%c0_27, %c0_28], %55 {strides = array<i32>} : memref<1x8xf32, #tpu.memory_space<vmem>>, vector<1x8xf32>,
      %cst_29 = arith.constant 0.000000e+00 : f32
      %57 = vector.broadcast %cst_29 : f32 to vector<1x8xf32>
      %c0_30 = arith.constant 0 : index
      %c0_31 = arith.constant 0 : index
      %58 = vector.load %arg6[%c0_30, %c0_31] : memref<1x8xf32, #tpu.memory_space<vmem>>, vector<1x8xf32>
      tpu.vector_store %arg6[%c0_30, %c0_31], %57 {strides = array<i32>} : memref<1x8xf32, #tpu.memory_space<vmem>>, vector<1x8xf32>,
    } else {
    }
    %c0 = arith.constant 0 : index
    %c0_1 = arith.constant 0 : index
    %3 = vector.load %arg1[%c0, %c0_1] : memref<128x32xf32, #tpu.memory_space<vmem>>, vector<128x32xf32>
    %c0_2 = arith.constant 0 : index
    %c0_3 = arith.constant 0 : index
    %4 = vector.load %arg2[%c0_2, %c0_3] : memref<128x3xf32, #tpu.memory_space<vmem>>, vector<128x3xf32>
    %c0_4 = arith.constant 0 : index
    %c0_5 = arith.constant 0 : index
    %5 = vector.load %arg3[%c0_4, %c0_5] : memref<104x128xf32, #tpu.memory_space<vmem>>, vector<3x80xf32>
    %c8 = arith.constant 8 : index
    %c0_6 = arith.constant 0 : index
    %6 = vector.load %arg3[%c8, %c0_6] : memref<104x128xf32, #tpu.memory_space<vmem>>, vector<1x80xf32>
    %c16 = arith.constant 16 : index
    %c0_7 = arith.constant 0 : index
    %7 = vector.load %arg3[%c16, %c0_7] : memref<104x128xf32, #tpu.memory_space<vmem>>, vector<32x8xf32>
    %c48 = arith.constant 48 : index
    %c0_8 = arith.constant 0 : index
    %8 = vector.load %arg3[%c48, %c0_8] : memref<104x128xf32, #tpu.memory_space<vmem>>, vector<16x8xf32>
    %c64 = arith.constant 64 : index
    %c0_9 = arith.constant 0 : index
    %9 = vector.load %arg3[%c64, %c0_9] : memref<104x128xf32, #tpu.memory_space<vmem>>, vector<1x8xf32>
    %cst = arith.constant dense<0.000000e+00> : vector<128x80xf32>
    %10 = tpu.matmul %4, %5, %cst {dimension_numbers = #tpu.dot_dimension_numbers<[1], [0], [0], [1], [0, 0, 1, 1], [], []>} : vector<128x3xf32>, vector<3x80xf32>, vector<128x80xf32> -> vector<128x80xf32>
    %11 = vector.broadcast %6 : vector<1x80xf32> to vector<128x80xf32>
    %12 = arith.addf %10, %11 : vector<128x80xf32>
    %13 = vector.extract_strided_slice %12 {offsets = [0, 0], sizes = [128, 16], strides = [1, 1]} : vector<128x80xf32> to vector<128x16xf32>
    %cst_10 = arith.constant 0.000000e+00 : f32
    %14 = vector.broadcast %cst_10 : f32 to vector<128x16xf32>
    %15 = arith.maximumf %13, %14 : vector<128x16xf32>
    %16 = vector.extract_strided_slice %12 {offsets = [0, 16], sizes = [128, 32], strides = [1, 1]} : vector<128x80xf32> to vector<128x32xf32>
    %17 = arith.negf %16 : vector<128x32xf32>
    %18 = math.exp %17 : vector<128x32xf32>
    %cst_11 = arith.constant 1.000000e+00 : f32
    %19 = vector.broadcast %cst_11 : f32 to vector<128x32xf32>
    %20 = arith.addf %19, %18 : vector<128x32xf32>
    %21 = arith.divf %19, %20 : vector<128x32xf32>
    %22 = vector.extract_strided_slice %12 {offsets = [0, 48], sizes = [128, 32], strides = [1, 1]} : vector<128x80xf32> to vector<128x32xf32>
    %23 = math.tanh %22 : vector<128x32xf32>
    %24 = arith.addf %21, %23 : vector<128x32xf32>
    %25 = arith.mulf %3, %24 : vector<128x32xf32>
    %cst_12 = arith.constant dense<0.000000e+00> : vector<128x8xf32>
    %26 = tpu.matmul %25, %7, %cst_12 {dimension_numbers = #tpu.dot_dimension_numbers<[1], [0], [0], [1], [0, 0, 1, 1], [], []>} : vector<128x32xf32>, vector<32x8xf32>, vector<128x8xf32> -> vector<128x8xf32>
    %cst_13 = arith.constant dense<0.000000e+00> : vector<128x8xf32>
    %27 = tpu.matmul %15, %8, %cst_13 {dimension_numbers = #tpu.dot_dimension_numbers<[1], [0], [0], [1], [0, 0, 1, 1], [], []>} : vector<128x16xf32>, vector<16x8xf32>, vector<128x8xf32> -> vector<128x8xf32>
    %28 = arith.addf %26, %27 : vector<128x8xf32>
    %29 = vector.broadcast %9 : vector<1x8xf32> to vector<128x8xf32>
    %30 = arith.addf %28, %29 : vector<128x8xf32>
    %31 = tpu.iota {dimensions = array<i32: 0>} : vector<128x1xi32>
    %c128_i32 = arith.constant 128 : i32
    %32 = arith.muli %arg0, %c128_i32 : i32
    %33 = vector.broadcast %32 : i32 to vector<128x1xi32>
    %34 = arith.addi %31, %33 : vector<128x1xi32>
    %c300_i32 = arith.constant 300 : i32
    %35 = vector.broadcast %c300_i32 : i32 to vector<128x1xi32>
    %36 = arith.cmpi slt, %34, %35 : vector<128x1xi32>
    %cst_14 = arith.constant 0.000000e+00 : f32
    %37 = vector.shape_cast %36 : vector<128x1xi1> to vector<128x1xi1>
    %38 = vector.broadcast %37 : vector<128x1xi1> to vector<128x8xi1>
    %39 = vector.broadcast %cst_14 : f32 to vector<128x8xf32>
    %40 = arith.select %38, %30, %39 : vector<128x8xi1>, vector<128x8xf32>
    %c0_15 = arith.constant 0 : index
    %c0_16 = arith.constant 0 : index
    %41 = vector.load %arg5[%c0_15, %c0_16] : memref<1x8xf32, #tpu.memory_space<vmem>>, vector<1x8xf32>
    %cst_17 = arith.constant dense<0.000000e+00> : vector<8xf32>
    %42 = vector.multi_reduction <add>, %40, %cst_17 [0] : vector<128x8xf32> to vector<8xf32>
    %43 = vector.shape_cast %42 : vector<8xf32> to vector<1x8xf32>
    %44 = arith.addf %41, %43 : vector<1x8xf32>
    %c0_18 = arith.constant 0 : index
    %c0_19 = arith.constant 0 : index
    %45 = vector.load %arg5[%c0_18, %c0_19] : memref<1x8xf32, #tpu.memory_space<vmem>>, vector<1x8xf32>
    tpu.vector_store %arg5[%c0_18, %c0_19], %44 {strides = array<i32>} : memref<1x8xf32, #tpu.memory_space<vmem>>, vector<1x8xf32>,
    %c0_20 = arith.constant 0 : index
    %c0_21 = arith.constant 0 : index
    %46 = vector.load %arg6[%c0_20, %c0_21] : memref<1x8xf32, #tpu.memory_space<vmem>>, vector<1x8xf32>
    %47 = arith.mulf %40, %40 : vector<128x8xf32>
    %cst_22 = arith.constant dense<0.000000e+00> : vector<8xf32>
    %48 = vector.multi_reduction <add>, %47, %cst_22 [0] : vector<128x8xf32> to vector<8xf32>
    %49 = vector.shape_cast %48 : vector<8xf32> to vector<1x8xf32>
    %50 = arith.addf %46, %49 : vector<1x8xf32>
    %c0_23 = arith.constant 0 : index
    %c0_24 = arith.constant 0 : index
    %51 = vector.load %arg6[%c0_23, %c0_24] : memref<1x8xf32, #tpu.memory_space<vmem>>, vector<1x8xf32>
    tpu.vector_store %arg6[%c0_23, %c0_24], %50 {strides = array<i32>} : memref<1x8xf32, #tpu.memory_space<vmem>>, vector<1x8xf32>,
    %c2_i32 = arith.constant 2 : i32
    %52 = arith.cmpi eq, %arg0, %c2_i32 : i32
    %53 = arith.extui %52 : i1 to i32
    %c0_i32_25 = arith.constant 0 : i32
    %54 = arith.cmpi ne, %53, %c0_i32_25 : i32
    scf.if %54 {
      %c72 = arith.constant 72 : index
      %c0_26 = arith.constant 0 : index
      %55 = vector.load %arg3[%c72, %c0_26] : memref<104x128xf32, #tpu.memory_space<vmem>>, vector<1x8xf32>
      %c80 = arith.constant 80 : index
      %c0_27 = arith.constant 0 : index
      %56 = vector.load %arg3[%c80, %c0_27] : memref<104x128xf32, #tpu.memory_space<vmem>>, vector<1x8xf32>
      %c0_28 = arith.constant 0 : index
      %c0_29 = arith.constant 0 : index
      %57 = vector.load %arg5[%c0_28, %c0_29] : memref<1x8xf32, #tpu.memory_space<vmem>>, vector<1x8xf32>
      %cst_30 = arith.constant 0.00333333341 : f32
      %58 = vector.broadcast %cst_30 : f32 to vector<1x8xf32>
      %59 = arith.mulf %57, %58 : vector<1x8xf32>
      %c0_31 = arith.constant 0 : index
      %c0_32 = arith.constant 0 : index
      %60 = vector.load %arg6[%c0_31, %c0_32] : memref<1x8xf32, #tpu.memory_space<vmem>>, vector<1x8xf32>
      %cst_33 = arith.constant 0.00333333341 : f32
      %61 = vector.broadcast %cst_33 : f32 to vector<1x8xf32>
      %62 = arith.mulf %60, %61 : vector<1x8xf32>
      %63 = arith.mulf %59, %59 : vector<1x8xf32>
      %64 = arith.subf %62, %63 : vector<1x8xf32>
      %cst_34 = arith.constant 9.99999974E-6 : f32
      %65 = vector.broadcast %cst_34 : f32 to vector<1x8xf32>
      %66 = arith.addf %64, %65 : vector<1x8xf32>
      %67 = math.rsqrt %66 : vector<1x8xf32>
      %68 = arith.mulf %67, %55 : vector<1x8xf32>
      %69 = arith.mulf %59, %68 : vector<1x8xf32>
      %70 = arith.subf %56, %69 : vector<1x8xf32>
      %c0_35 = arith.constant 0 : index
      %c0_36 = arith.constant 0 : index
      %71 = vector.load %arg4[%c0_35, %c0_36] : memref<2x8xf32, #tpu.memory_space<vmem>>, vector<1x8xf32>
      tpu.vector_store %arg4[%c0_35, %c0_36], %68 {strides = array<i32>} : memref<2x8xf32, #tpu.memory_space<vmem>>, vector<1x8xf32>,
      %c1 = arith.constant 1 : index
      %c0_37 = arith.constant 0 : index
      %72 = vector.load %arg4[%c1, %c0_37] : memref<2x8xf32, #tpu.memory_space<vmem>>, vector<1x8xf32>
      tpu.vector_store %arg4[%c1, %c0_37], %70 {strides = array<i32>} : memref<2x8xf32, #tpu.memory_space<vmem>>, vector<1x8xf32>,
    } else {
    }
    return
  }
  func.func @transform_0(%arg0: i32) -> (i32, i32) {
    %c0_i32 = arith.constant 0 : i32
    %c0_i32_0 = arith.constant 0 : i32
    return %arg0, %c0_i32 : i32, i32
  }
  func.func @transform_1(%arg0: i32) -> (i32, i32) {
    %c0_i32 = arith.constant 0 : i32
    %c0_i32_0 = arith.constant 0 : i32
    return %arg0, %c0_i32 : i32, i32
  }
  func.func @transform_2(%arg0: i32) -> (i32, i32) {
    %c0_i32 = arith.constant 0 : i32
    %c0_i32_0 = arith.constant 0 : i32
    %c0_i32_1 = arith.constant 0 : i32
    return %c0_i32, %c0_i32_0 : i32, i32
  }
  func.func @transform_3(%arg0: i32) -> (i32, i32) {
    %c0_i32 = arith.constant 0 : i32
    %c0_i32_0 = arith.constant 0 : i32
    %c0_i32_1 = arith.constant 0 : i32
    return %c0_i32, %c0_i32_0 : i32, i32
  }
}

</mosaic_0001>

<bundles_post_ra>
// kernel: tpu_custom_call.1
= control target key start
LH: loop header
LB: loop body
LE: loop exit
PB: predicated region body
PF: predicated region fallthrough
CT: control target
= control target key end

     0   :  { %8 = vsyncpa [#allocation5], 0  ;;  %s1643_s12 = smov 0   ;;  %s2234_s0 = inlined_call_operand.vmem [shape: f32[384,32], index: 0, kind: input, shape index: {}]   ;;  %s2235_s1 = inlined_call_operand.vmem [shape: f32[384,3], index: 1, kind: input, shape index: {}]   ;;  %s2236_s2 = inlined_call_operand.vmem [shape: f32[104,128], index: 2, kind: input, shape index: {}]   ;;  %s2237_s3 = inlined_call_operand.hbm [shape: f32[2,8], index: 3, kind: output, shape index: {}]  }
   0x1 LB: > { %s1649_s13 = sadd.s32 4294967295, %s1617_s12   ;;  %p1377_p0 = scmp.ge.s32.totalorder %s1617_s12, 1  ;;  %s1617_s12 = sphi %s1643_s12, %s14_s12  }
   0x2   : > { %p145_p1 = scmp.lt.s32.totalorder %s1617_s12, 4 }
   0x4   : > { %p146_p2 = pnand %p1377_p0, %p145_p1 }
   0x5   : > { %s1378_s14 = sshll.u32 (!%p146_p2), %s1649_s13, 4  ;;  %p1382_p4 = scmp.ne.s32.totalorder (!%p146_p2), %s1649_s13, 0 }
   0x6   : > { %149 = sbr.rel (%p146_p2) target bundleno = 755 (0x2f3), region = 32  ;;  %p170_p3 = scmp.lt.s32.totalorder (!%p146_p2), %s1378_s14, 47 }
   0xb   : > { %s2257_s14 = smov (!%p170_p3, %s1378_s14), 47  ;;  %184 = sbr.rel (%p1382_p4) target bundleno = 19 (0x13), region = 36 }
   0xc   : > { %s1379_s15 = sshll.u32 %s2257_s14, 3 }
   0xd   : > { %s1657_s18 = scalar_lea.vmem %s2234_s0, %s1379_s15  ;;  %s1662_s21 = scalar_lea.vmem %s2235_s1, %s1379_s15 }
  0x10   : > { %vm185_vm0 = vcmask 57344   ;;  %v1619_v0 = vmov 0.0  }
  0x11   : > { %186 = vst.msk [vmem:[#allocation2] sm:$0x1] %vm185_vm0, %v1619_v0 }
  0x12   : > { %187 = vst.msk [vmem:[#allocation3] sm:$0x1] %vm185_vm0, %v1619_v0 }
  0x13 PF: > { %v220_v1 = vld [vmem:[%s2236_s2] sm:$0x7]  ;;  %vm279_vm1 = vcmask 1042432   ;;  %vm230_vm2 = vcmask 23552   ;;  %v205_v3 = vld [vmem:[%s1662_s21 + $0x8] sm:$0xff]  ;;  %v206_v4 = vld [vmem:[%s1662_s21 + $0x10] sm:$0xff] }
  0x14   : > { %v204_v2 = vld [vmem:[%s1662_s21] sm:$0xff]  ;;  %1383 = vmatpush.msk.msra.mxu0 %vm279_vm1, %v220_v1  ;;  %1454 = vmatpush.msk.msra.mxu3 %vm279_vm1, %v220_v1  ;;  %v207_v5 = vld [vmem:[%s1662_s21 + $0x18] sm:$0xff]  ;;  %v209_v7 = vld [vmem:[%s1662_s21 + $0x28] sm:$0xff]  ;;  %vm844_vm3 = vcmask 130048   ;;  %s1620_s30 = smov 96   ;;  %s1621_s4 = smov 112  }
  0x15   : > { %1384 = vmatmul.msk.f32.vlgmr.msra.gmra.mxu0 %vm230_vm2, %v204_v2  ;;  %v208_v6 = vld [vmem:[%s1662_s21 + $0x20] sm:$0xff]  ;;  %v210_v8 = vld [vmem:[%s1662_s21 + $0x30] sm:$0xff]  ;;  %v211_v9 = vld [vmem:[%s1662_s21 + $0x38] sm:$0xff]  ;;  %s1448_s15 = sshll.u32 %s1649_s13, 7  ;;  %p1449_p5 = scmp.ne.s32.totalorder %s1649_s13, 2 }
  0x16   : > { %v212_v10 = vld [vmem:[%s1662_s21 + $0x40] sm:$0xff]  ;;  %v213_v11 = vld [vmem:[%s1662_s21 + $0x48] sm:$0xff]  ;;  %v214_v12 = vld [vmem:[%s1662_s21 + $0x50] sm:$0xff] }
  0x17   : > { %v227_v13 = vld [vmem:[%s2236_s2 + $0x38] sm:$0xff]  ;;  %v226_v14 = vld [vmem:[%s2236_s2 + $0x30] sm:$0xff]  ;;  %v217_v15 = vld [vmem:[%s1662_s21 + $0x68] sm:$0xff] }
  0x18   : > { %907 = vmatpush.msra.mxu1 %v227_v13  ;;  %1455 = vmatpush.msrb.mxu3 %v227_v13  ;;  %v215_v16 = vld [vmem:[%s1662_s21 + $0x58] sm:$0xff]  ;;  %v218_v17 = vld [vmem:[%s1662_s21 + $0x70] sm:$0xff]  ;;  %v216_v18 = vld [vmem:[%s1662_s21 + $0x60] sm:$0xff] }
  0x19   : > { %1397 = vmatmul.msk.f32.vlgmr.msra.gmra.mxu3 %vm230_vm2, %v217_v15  ;;  %v219_v19 = vld [vmem:[%s1662_s21 + $0x78] sm:$0xff]  ;;  %v1709_v20 = vld [vmem:[%s2236_s2 + $0x8] ss:$0 sm:$0xff] }
  0x1a   : > { %908 = vmatpush.msra.mxu1 %v226_v14  ;;  %1456 = vmatpush.msrb.mxu3 %v226_v14 }
  0x1d   : > { %1385 = vmatmul.msk.f32.gmra.mxu0 %vm230_vm2, %v205_v3 }
  0x21   : > { %1398 = vmatmul.msk.f32.gmra.mxu3 %vm230_vm2, %v218_v17 }
  0x25   : > { %1386 = vmatmul.msk.f32.gmra.mxu0 %vm230_vm2, %v206_v4 }
  0x29   : > { %1399 = vmatmul.msk.f32.gmra.mxu3 %vm230_vm2, %v219_v19 }
  0x2d   : > { %1387 = vmatmul.msk.f32.gmra.mxu0 %vm230_vm2, %v207_v5 }
  0x35   : > { %1388 = vmatmul.msk.f32.gmra.mxu0 %vm230_vm2, %v208_v6 }
  0x3d   : > { %1389 = vmatmul.msk.f32.gmra.mxu0 %vm230_vm2, %v209_v7 }
  0x45   : > { %1390 = vmatmul.msk.f32.gmra.mxu0 %vm230_vm2, %v210_v8 }
  0x4d   : > { %1391 = vmatmul.msk.f32.gmra.mxu0 %vm230_vm2, %v211_v9 }
  0x55   : > { %1392 = vmatmul.msk.f32.gmra.mxu0 %vm230_vm2, %v212_v10 }
  0x5d   : > { %1393 = vmatmul.msk.f32.gmra.mxu0 %vm230_vm2, %v213_v11 }
  0x65   : > { %1394 = vmatmul.msk.f32.gmra.mxu0 %vm230_vm2, %v214_v12 }
  0x6d   : > { %1395 = vmatmul.msk.f32.gmra.mxu0 %vm230_vm2, %v215_v16 }
  0x75   : > { %1396 = vmatmul.msk.f32.gmra.mxu0 %vm230_vm2, %v216_v18 }
  0x92   : > { %v300_v21 = vpop.f32.mrf.mxu0 }
  0x93   : > { %v301_v22 = vadd.f32 %v1709_v20, %v300_v21 }
  0x95   : > { %1481 = vtanh.f32 %v301_v22  ;;  %v348_v23 = vmax.f32 %v301_v22, 0.0  ;;  %v1400_v51 = vmul.f32 -1.442695, %v301_v22 }
  0x97   : > { %1416 = vmatmul.msk.f32.vlgmr.msra.gmra.mxu1 %vm844_vm3, %v348_v23 }
  0x9a   : > { %v303_v24 = vpop.f32.mrf.mxu0 }
  0x9b   : > { %v1482_v25 = vpop.eup %1481  ;;  %v304_v26 = vadd.f32 %v1709_v20, %v303_v24 }
  0x9c   : > { %700 = vrot.lane.b32.xlu0 %v1482_v25, %s1620_s30  ;;  %v339_v11 = vpop.f32.mrf.mxu3 }
  0x9d   : > { %1483 = vtanh.f32 %v304_v26  ;;  %v349_v27 = vmax.f32 %v304_v26, 0.0  ;;  %v1401_v53 = vmul.f32 -1.442695, %v304_v26  ;;  %v1778_v25 = vadd.f32 %v1709_v20, %v339_v11 }
  0x9f   : > { %1417 = vmatmul.msk.f32.gmra.mxu1 %vm844_vm3, %v349_v27 }
  0xa2   : > { %v306_v28 = vpop.f32.mrf.mxu0 }
  0xa3   : > { %v1484_v29 = vpop.eup %1483  ;;  %v307_v30 = vadd.f32 %v1709_v20, %v306_v28 }
  0xa4   : > { %702 = vrot.lane.b32.xlu0 %v1484_v29, %s1620_s30  ;;  %v361_v29 = vmax.f32 %v1778_v25, 0.0 }
  0xa5   : > { %1485 = vtanh.f32 %v307_v30  ;;  %v350_v31 = vmax.f32 %v307_v30, 0.0  ;;  %v1402_v58 = vmul.f32 -1.442695, %v307_v30 }
  0xa7   : > { %1418 = vmatmul.msk.f32.gmra.mxu1 %vm844_vm3, %v350_v31 }
  0xaa   : > { %v309_v32 = vpop.f32.mrf.mxu0 }
  0xab   : > { %v1486_v33 = vpop.eup %1485  ;;  %v310_v34 = vadd.f32 %v1709_v20, %v309_v32 }
  0xac   : > { %704 = vrot.lane.b32.xlu1 %v1486_v33, %s1620_s30  ;;  %v342_v33 = vpop.f32.mrf.mxu3 }
  0xad   : > { %1487 = vtanh.f32 %v310_v34  ;;  %v351_v35 = vmax.f32 %v310_v34, 0.0  ;;  %v1403_v1 = vmul.f32 -1.442695, %v310_v34 }
  0xaf   : > { %1419 = vmatmul.msk.f32.gmra.mxu1 %vm844_vm3, %v351_v35 }
  0xb2   : > { %v312_v36 = vpop.f32.mrf.mxu0 }
  0xb3   : > { %v1488_v37 = vpop.eup %1487  ;;  %v313_v38 = vadd.f32 %v1709_v20, %v312_v36 }
  0xb4   : > { %706 = vrot.lane.b32.xlu1 %v1488_v37, %s1620_s30 }
  0xb5   : > { %1489 = vtanh.f32 %v313_v38  ;;  %v352_v39 = vmax.f32 %v313_v38, 0.0  ;;  %v1404_v12 = vmul.f32 -1.442695, %v313_v38 }
  0xb7   : > { %1420 = vmatmul.msk.f32.gmra.mxu1 %vm844_vm3, %v352_v39 }
  0xba   : > { %v315_v40 = vpop.f32.mrf.mxu0 }
  0xbb   : > { %v1490_v41 = vpop.eup %1489  ;;  %v1726_v42 = vadd.f32 %v1709_v20, %v315_v40 }
  0xbc   : > { %708 = vrot.lane.b32.xlu2 %v1490_v41, %s1620_s30 }
  0xbd   : > { %1491 = vtanh.f32 %v1726_v42  ;;  %v353_v43 = vmax.f32 %v1726_v42, 0.0  ;;  %v1405_v27 = vmul.f32 -1.442695, %v1726_v42 }
  0xbf   : > { %1421 = vmatmul.msk.f32.gmra.mxu1 %vm844_vm3, %v353_v43 }
  0xc2   : > { %v318_v44 = vpop.f32.mrf.mxu0 }
  0xc3   : > { %v1492_v45 = vpop.eup %1491  ;;  %v1733_v46 = vadd.f32 %v1709_v20, %v318_v44 }
  0xc4   : > { %710 = vrot.lane.b32.xlu2 %v1492_v45, %s1620_s30  ;;  %v1801_v45 = vadd.f32 %v1709_v20, %v342_v33 }
  0xc5   : > { %1493 = vtanh.f32 %v1733_v46  ;;  %v354_v47 = vmax.f32 %v1733_v46, 0.0 }
  0xc6   : > { %1495 = vpow2.f32 %v1400_v51  ;;  %v362_v51 = vmax.f32 %v1801_v45, 0.0 }
  0xc7   : > { %1422 = vmatmul.msk.f32.gmra.mxu1 %vm844_vm3, %v354_v47  ;;  %1497 = vpow2.f32 %v1401_v53  ;;  %v1406_v47 = vmul.f32 -1.442695, %v1733_v46 }
  0xca   : > { %v321_v49 = vpop.f32.mrf.mxu0 }
  0xcb   : > { %v1494_v48 = vpop.eup %1493  ;;  %v1741_v57 = vadd.f32 %v1709_v20, %v321_v49 }
  0xcc   : > { %712 = vrot.lane.b32.xlu1 %v1494_v48, %s1620_s30  ;;  %v1496_v54 = vpop.eup %1495 }
  0xcd   : > { %v412_v55 = vadd.f32 1.0, %v1496_v54  ;;  %v355_v59 = vmax.f32 %v1741_v57, 0.0  ;;  %v1498_v60 = vpop.eup %1497 }
  0xce   : > { %v1745_v61 = vadd.f32 1.0, %v1498_v60 }
  0xcf   : > { %1499 = vrcp.f32 %v412_v55  ;;  %1423 = vmatmul.msk.f32.gmra.mxu1 %vm844_vm3, %v355_v59  ;;  %v439_v23 = vand.u32 2147483648, %v412_v55  ;;  %vm433_vm5 = vweird.f32 %v412_v55  ;;  %v437_v26 = vand.u32 2147483647, %v412_v55 }
  0xd0   : > { %1501 = vpow2.f32 %v1402_v58  ;;  %v454_v43 = vand.u32 2147483648, %v1745_v61  ;;  %vm448_vm9 = vweird.f32 %v1745_v61  ;;  %v452_v48 = vand.u32 2147483647, %v1745_v61 }
  0xd1   : > { %1503 = vrcp.f32 %v1745_v61  ;;  %v440_v35 = vor.u32 1.1754944e-38, %v439_v23  ;;  %vm438_vm7 = vcmp.eq.f32.partialorder %v437_v26, 8.507059e+37 }
  0xd2   : > { %v324_v50 = vpop.f32.mrf.mxu0  ;;  %1505 = vpow2.f32 %v1403_v1  ;;  %vm453_vm11 = vcmp.eq.f32.partialorder %v452_v48, 8.507059e+37 }
  0xd3   : > { %v1748_v0 = vadd.f32 %v1709_v20, %v324_v50 }
  0xd5   : > { %v1500_v63 = vpop.eup %1499  ;;  %v356_v2 = vmax.f32 %v1748_v0, 0.0 }
  0xd6   : > { %v1502_v3 = vpop.eup %1501  ;;  %v429_v4 = vmul.f32 %v1500_v63, %v412_v55  ;;  %vm434_vm4 = vweird.f32 %v1500_v63  ;;  %v455_v55 = vor.u32 1.1754944e-38, %v454_v43 }
  0xd7   : > { %1424 = vmatmul.msk.f32.gmra.mxu1 %vm844_vm3, %v356_v2  ;;  %v1753_v5 = vadd.f32 1.0, %v1502_v3  ;;  %v1755_v8 = vpop.eup %1503  ;;  %vm435_vm6 = vmor %vm433_vm5, %vm434_vm4 }
  0xd8   : > { %v430_v6 = vsub.f32 1.0, %v429_v4  ;;  %v1506_v14 = vpop.eup %1505  ;;  %v444_v16 = vmul.f32 %v1755_v8, %v1745_v61  ;;  %vm449_vm8 = vweird.f32 %v1755_v8 }
  0xd9   : > { %1507 = vrcp.f32 %v1753_v5  ;;  %v1770_v18 = vadd.f32 1.0, %v1506_v14  ;;  %vm1809_vm10 = vmor %vm448_vm9, %vm449_vm8  ;;  %v469_v2 = vand.u32 2147483648, %v1753_v5  ;;  %vm463_vm13 = vweird.f32 %v1753_v5 }
  0xda   : > { %v327_v52 = vpop.f32.mrf.mxu0  ;;  %v431_v15 = vmul.f32 %v1500_v63, %v430_v6  ;;  %1509 = vpow2.f32 %v1404_v12  ;;  %v445_v21 = vsub.f32 1.0, %v444_v16  ;;  %v467_v6 = vand.u32 2147483647, %v1753_v5 }
  0xdb   : > { %v1761_v10 = vadd.f32 %v1709_v20, %v327_v52  ;;  %1511 = vrcp.f32 %v1770_v18  ;;  %v470_v14 = vor.u32 1.1754944e-38, %v469_v2  ;;  %vm478_vm0 = vweird.f32 %v1770_v18 }
  0xdc   : > { %v432_v19 = vadd.f32 %v1500_v63, %v431_v15  ;;  %v446_v31 = vmul.f32 %v1755_v8, %v445_v21  ;;  %1513 = vpow2.f32 %v1405_v27  ;;  %vm468_vm15 = vcmp.eq.f32.partialorder %v467_v6, 8.507059e+37 }
  0xdd   : > { %v357_v17 = vmax.f32 %v1761_v10, 0.0  ;;  %1515 = vtanh.f32 %v1741_v57  ;;  %v482_v23 = vand.u32 2147483647, %v1770_v18 }
  0xde   : > { %v436_v30 = vsel %vm435_vm6, %v1500_v63, %v432_v19  ;;  %v447_v40 = vadd.f32 %v1755_v8, %v446_v31  ;;  %v484_v19 = vand.u32 2147483648, %v1770_v18 }
  0xdf   : > { %1425 = vmatmul.msk.f32.gmra.mxu1 %vm844_vm3, %v357_v17  ;;  %v1772_v22 = vpop.eup %1507  ;;  %v441_v37 = vsel %vm438_vm7, %v440_v35, %v436_v30 }
  0xe0   : > { %v459_v32 = vmul.f32 %v1772_v22, %v1753_v5  ;;  %v1510_v34 = vpop.eup %1509  ;;  %v451_v46 = vsel %vm1809_vm10, %v1755_v8, %v447_v40  ;;  %vm464_vm12 = vweird.f32 %v1772_v22 }
  0xe1   : > { %v1790_v38 = vadd.f32 1.0, %v1510_v34  ;;  %v1793_v42 = vpop.eup %1511  ;;  %v456_v59 = vsel %vm453_vm11, %v455_v55, %v451_v46  ;;  %vm1839_vm14 = vmor %vm463_vm13, %vm464_vm12 }
  0xe2   : > { %v330_v56 = vpop.f32.mrf.mxu0  ;;  %v460_v41 = vsub.f32 1.0, %v459_v32  ;;  %v474_v53 = vmul.f32 %v1793_v42, %v1770_v18  ;;  %v1514_v54 = vpop.eup %1513  ;;  %vm479_vm1 = vweird.f32 %v1793_v42 }
  0xe3   : > { %v1775_v24 = vadd.f32 %v1709_v20, %v330_v56  ;;  %1517 = vrcp.f32 %v1790_v38  ;;  %v345_v56 = vpop.f32.mrf.mxu3  ;;  %v1516_v58 = vpop.eup %1515  ;;  %v1825_v61 = vadd.f32 1.0, %v1514_v54  ;;  %vm480_vm2 = vmor %vm478_vm0, %vm479_vm1  ;;  %vm493_vm4 = vweird.f32 %v1790_v38 }
  0xe4   : > { %v461_v52 = vmul.f32 %v1772_v22, %v460_v41  ;;  %1519 = vpow2.f32 %v1406_v47  ;;  %v475_v1 = vsub.f32 1.0, %v474_v53  ;;  %v1831_v3 = vadd.f32 %v1709_v20, %v345_v56 }
  0xe5   : > { %v358_v28 = vmax.f32 %v1775_v24, 0.0  ;;  %1521 = vtanh.f32 %v1748_v0  ;;  %v499_v35 = vand.u32 2147483648, %v1790_v38  ;;  %v497_v40 = vand.u32 2147483647, %v1790_v38 }
  0xe6   : > { %v462_v63 = vadd.f32 %v1772_v22, %v461_v52  ;;  %v363_v8 = vmax.f32 %v1831_v3, 0.0  ;;  %1523 = vrcp.f32 %v1825_v61  ;;  %v476_v12 = vmul.f32 %v1793_v42, %v475_v1 }
  0xe7   : > { %1426 = vmatmul.msk.f32.gmra.mxu1 %vm844_vm3, %v358_v28  ;;  %1525 = vtanh.f32 %v1761_v10  ;;  %v485_v28 = vor.u32 1.1754944e-38, %v484_v19  ;;  %v500_v43 = vor.u32 1.1754944e-38, %v499_v35  ;;  %vm498_vm7 = vcmp.eq.f32.partialorder %v497_v40, 8.507059e+37  ;;  %v224_v19 = vld [vmem:[%s2236_s2 + $0x20] sm:$0xff] }
  0xe8   : > { %vm508_vm8 = vweird.f32 %v1825_v61  ;;  %v514_v46 = vand.u32 2147483648, %v1825_v61  ;;  %v512_v55 = vand.u32 2147483647, %v1825_v61 }
  0xe9   : > { %v1833_v4 = vpop.eup %1517 }
  0xea   : > { %v333_v62 = vpop.f32.mrf.mxu0  ;;  %v1520_v11 = vpop.eup %1519  ;;  %vm494_vm5 = vweird.f32 %v1833_v4  ;;  %v515_v56 = vor.u32 1.1754944e-38, %v514_v46  ;;  %vm513_vm11 = vcmp.eq.f32.partialorder %v512_v55, 8.507059e+37 }
  0xeb   : > { %v1798_v44 = vadd.f32 %v1709_v20, %v333_v62  ;;  %v1522_v5 = vpop.eup %1521  ;;  %v1854_v15 = vadd.f32 1.0, %v1520_v11  ;;  %vm495_vm6 = vmor %vm493_vm4, %vm494_vm5 }
  0xec   : > { %v1524_v27 = vpop.eup %1523 }
  0xed   : > { %v359_v50 = vmax.f32 %v1798_v44, 0.0  ;;  %v504_v31 = vmul.f32 %v1524_v27, %v1825_v61  ;;  %v1526_v18 = vpop.eup %1525  ;;  %vm509_vm9 = vweird.f32 %v1524_v27  ;;  %vm523_vm12 = vweird.f32 %v1854_v15 }
  0xee   : > { %vm510_vm10 = vmor %vm508_vm8, %vm509_vm9  ;;  %v529_v61 = vand.u32 2147483648, %v1854_v15 }
  0xef   : > { %1427 = vmatmul.msk.f32.gmra.mxu1 %vm844_vm3, %v359_v50  ;;  %v505_v41 = vsub.f32 1.0, %v504_v31 }
  0xf1   : > { %v506_v49 = vmul.f32 %v1524_v27, %v505_v41 }
  0xf2   : > { %v336_v7 = vpop.f32.mrf.mxu0 }
  0xf3   : > { %v1758_v9 = vadd.f32 %v1709_v20, %v336_v7  ;;  %v466_v20 = vsel %vm1839_vm14, %v1772_v22, %v462_v63  ;;  %v477_v22 = vadd.f32 %v1793_v42, %v476_v12  ;;  %v507_v54 = vadd.f32 %v1524_v27, %v506_v49 }
  0xf4   : > { %v471_v17 = vsel %vm468_vm15, %v470_v14, %v466_v20  ;;  %v530_v7 = vor.u32 1.1754944e-38, %v529_v61  ;;  %v1408_v14 = vmul.f32 -1.442695, %v1748_v0  ;;  %v223_v0 = vld [vmem:[%s2236_s2 + $0x18] sm:$0xff] }
  0xf5   : > { %v360_v13 = vmax.f32 %v1758_v9, 0.0  ;;  %1527 = vtanh.f32 %v1758_v9 }
  0xf6   : > { %1529 = vrcp.f32 %v1854_v15 }
  0xf7   : > { %1428 = vmatmul.msk.f32.vlgmr.msrb.gmra.mxu3 %vm844_vm3, %v360_v13  ;;  %v489_v13 = vmul.f32 %v1833_v4, %v1790_v38  ;;  %1531 = vtanh.f32 %v1775_v24 }
  0xf8   : > { %1533 = vtanh.f32 %v1778_v25 }
  0xf9   : > { %v490_v26 = vsub.f32 1.0, %v489_v13  ;;  %1535 = vtanh.f32 %v1798_v44 }
  0xfa   : > { %1537 = vtanh.f32 %v1801_v45 }
  0xfb   : > { %v491_v30 = vmul.f32 %v1833_v4, %v490_v26  ;;  %v1528_v32 = vpop.eup %1527  ;;  %1539 = vtanh.f32 %v1831_v3 }
  0xfc   : > { %1541 = vpow2.f32 %v1408_v14 }
  0xff   : > { %1429 = vmatmul.msk.f32.gmra.mxu3 %vm844_vm3, %v361_v29  ;;  %v481_v29 = vsel %vm480_vm2, %v1793_v42, %v477_v22  ;;  %v1412_v22 = vmul.f32 -1.442695, %v1758_v9 }
 0x107   : > { %1430 = vmatmul.msk.f32.gmra.mxu3 %vm844_vm3, %v362_v51 }
 0x10e   : > { %v701_v36 = vpop.permute.xlu0 %700 }
 0x10f   : > { %v748_v39 = vadd.f32 %v701_v36, %v441_v37  ;;  %1431 = vmatmul.msk.f32.gmra.mxu3 %vm844_vm3, %v363_v8  ;;  %vm483_vm3 = vcmp.eq.f32.partialorder %v482_v23, 8.507059e+37  ;;  %v1530_v37 = vpop.eup %1529 }
 0x110   : > { %v486_v33 = vsel %vm483_vm3, %v485_v28, %v481_v29  ;;  %v519_v47 = vmul.f32 %v1530_v37, %v1854_v15  ;;  %v1532_v50 = vpop.eup %1531  ;;  %vm524_vm13 = vweird.f32 %v1530_v37 }
 0x111   : > { %780 = vrot.lane.b32.xlu0 %v748_v39, %s1621_s4  ;;  %v492_v39 = vadd.f32 %v1833_v4, %v491_v30  ;;  %v1534_v38 = vpop.eup %1533  ;;  %vm525_vm14 = vmor %vm523_vm12, %vm524_vm13 }
 0x112   : > { %v520_v52 = vsub.f32 1.0, %v519_v47  ;;  %v1411_v47 = vmul.f32 -1.442695, %v1798_v44 }
 0x113   : > { %v496_v48 = vsel %vm495_vm6, %v1833_v4, %v492_v39  ;;  %v527_v4 = vand.u32 2147483647, %v1854_v15  ;;  %vm958_vm6 = vcmask 261120  }
 0x114   : > { %v501_v51 = vsel %vm498_vm7, %v500_v43, %v496_v48 }
 0x115   : > { %vm528_vm15 = vcmp.eq.f32.partialorder %v527_v4, 8.507059e+37 }
 0x116   : > { %v703_v60 = vpop.permute.xlu0 %702  ;;  %v709_v42 = vpop.permute.xlu2 %708 }
 0x117   : > { %v749_v62 = vadd.f32 %v703_v60, %v456_v59  ;;  %v752_v53 = vadd.f32 %v709_v42, %v501_v51  ;;  %v511_v59 = vsel %vm510_vm10, %v1524_v27, %v507_v54  ;;  %v1536_v60 = vpop.eup %1535  ;;  %v1409_v27 = vmul.f32 -1.442695, %v1761_v10  ;;  %v188_v54 = vld [vmem:[%s1657_s18] sm:$0xff] }
 0x118   : > { %v1538_v63 = vpop.eup %1537  ;;  %v516_v1 = vsel %vm513_vm11, %v515_v56, %v511_v59 }
 0x119   : > { %782 = vrot.lane.b32.xlu2 %v749_v62, %s1621_s4  ;;  %714 = vrot.lane.b32.xlu0 %v1516_v58, %s1620_s30  ;;  %v521_v58 = vmul.f32 %v1530_v37, %v520_v52  ;;  %v1540_v11 = vpop.eup %1539 }
 0x11b   : > { %v522_v2 = vadd.f32 %v1530_v37, %v521_v58 }
 0x11d   : > { %v526_v8 = vsel %vm525_vm14, %v1530_v37, %v522_v2  ;;  %v1410_v37 = vmul.f32 -1.442695, %v1775_v24  ;;  %v1415_v2 = vmul.f32 -1.442695, %v1831_v3 }
 0x11e   : > { %v705_v16 = vpop.permute.xlu1 %704  ;;  %v711_v62 = vpop.permute.xlu2 %710  ;;  %v531_v20 = vsel %vm528_vm15, %v530_v7, %v526_v8 }
 0x11f   : > { %v750_v21 = vadd.f32 %v705_v16, %v471_v17  ;;  %v753_v6 = vadd.f32 %v711_v62, %v516_v1  ;;  %v1407_v16 = vmul.f32 -1.442695, %v1741_v57  ;;  %v225_v17 = vld [vmem:[%s2236_s2 + $0x28] sm:$0xff]  ;;  %v222_v57 = vld [vmem:[%s2236_s2 + $0x10] sm:$0xff] }
 0x120   : > { %1019 = vmatpush.msra.mxu2 %v225_v17  ;;  %1457 = vmatpush.msra.mxu3 %v225_v17 }
 0x121   : > { %784 = vrot.lane.b32.xlu1 %v750_v21, %s1621_s4  ;;  %716 = vrot.lane.b32.xlu2 %v1522_v5, %s1620_s30  ;;  %v1542_v5 = vpop.eup %1541 }
 0x122   : > { %v420_v15 = vadd.f32 1.0, %v1542_v5  ;;  %1020 = vmatpush.msra.mxu2 %v224_v19  ;;  %1458 = vmatpush.msra.mxu3 %v224_v19 }
 0x124   : > { %1543 = vrcp.f32 %v420_v15  ;;  %1021 = vmatpush.msra.mxu2 %v223_v0  ;;  %1459 = vmatpush.msra.mxu3 %v223_v0  ;;  %vm553_vm0 = vweird.f32 %v420_v15  ;;  %v559_v9 = vand.u32 2147483648, %v420_v15  ;;  %v557_v35 = vand.u32 2147483647, %v420_v15 }
 0x125   : > { %1545 = vpow2.f32 %v1407_v16 }
 0x126   : > { %v707_v34 = vpop.permute.xlu1 %706  ;;  %1022 = vmatpush.msra.mxu2 %v222_v57  ;;  %1460 = vmatpush.msra.mxu3 %v222_v57  ;;  %1547 = vpow2.f32 %v1412_v22  ;;  %v560_v40 = vor.u32 1.1754944e-38, %v559_v9  ;;  %vm558_vm3 = vcmp.eq.f32.partialorder %v557_v35, 8.507059e+37 }
 0x127   : > { %v751_v36 = vadd.f32 %v707_v34, %v486_v33  ;;  %1549 = vpow2.f32 %v1409_v27  ;;  %v1413_v34 = vmul.f32 -1.442695, %v1778_v25 }
 0x129   : > { %718 = vrot.lane.b32.xlu1 %v1526_v18, %s1620_s30  ;;  %724 = vrot.lane.b32.xlu2 %v1528_v32, %s1620_s30 }
 0x12a   : > { %786 = vrot.lane.b32.xlu0 %v751_v36, %s1621_s4  ;;  %v1544_v21 = vpop.eup %1543 }
 0x12b   : > { %v1546_v23 = vpop.eup %1545  ;;  %v549_v26 = vmul.f32 %v1544_v21, %v420_v15  ;;  %vm554_vm1 = vweird.f32 %v1544_v21 }
 0x12c   : > { %v1912_v28 = vadd.f32 1.0, %v1546_v23  ;;  %v1548_v30 = vpop.eup %1547  ;;  %vm555_vm2 = vmor %vm553_vm0, %vm554_vm1 }
 0x12d   : > { %v550_v29 = vsub.f32 1.0, %v549_v26  ;;  %v1915_v18 = vadd.f32 1.0, %v1548_v30  ;;  %v1550_v33 = vpop.eup %1549 }
 0x12e   : > { %1551 = vrcp.f32 %v1912_v28  ;;  %v1921_v39 = vadd.f32 1.0, %v1550_v33  ;;  %vm538_vm4 = vweird.f32 %v1912_v28  ;;  %v544_v56 = vand.u32 2147483648, %v1912_v28 }
 0x12f   : > { %v551_v31 = vmul.f32 %v1544_v21, %v550_v29  ;;  %1553 = vrcp.f32 %v1915_v18  ;;  %v542_v62 = vand.u32 2147483647, %v1912_v28  ;;  %vm613_vm9 = vweird.f32 %v1915_v18 }
 0x130   : > { %1555 = vpow2.f32 %v1413_v34  ;;  %v619_v14 = vand.u32 2147483648, %v1915_v18  ;;  %v617_v0 = vand.u32 2147483647, %v1915_v18  ;;  %vm568_vm13 = vweird.f32 %v1921_v39 }
 0x131   : > { %720 = vrot.lane.b32.xlu1 %v1532_v50, %s1620_s30  ;;  %726 = vrot.lane.b32.xlu2 %v1534_v38, %s1620_s30  ;;  %v552_v10 = vadd.f32 %v1544_v21, %v551_v31  ;;  %1557 = vpow2.f32 %v1410_v37  ;;  %v1414_v50 = vmul.f32 -1.442695, %v1801_v45  ;;  %vm543_vm8 = vcmp.eq.f32.partialorder %v542_v62, 8.507059e+37  ;;  %v190_v31 = vld [vmem:[%s1657_s18 + $0x10] sm:$0xff] }
 0x132   : > { %788 = vrot.lane.b32.xlu0 %v752_v53, %s1621_s4  ;;  %1559 = vrcp.f32 %v1921_v39  ;;  %v620_v26 = vor.u32 1.1754944e-38, %v619_v14  ;;  %vm618_vm12 = vcmp.eq.f32.partialorder %v617_v0, 8.507059e+37  ;;  %v572_v9 = vand.u32 2147483647, %v1921_v39 }
 0x133   : > { %v556_v41 = vsel %vm555_vm2, %v1544_v21, %v552_v10  ;;  %1561 = vpow2.f32 %v1411_v47  ;;  %v574_v33 = vand.u32 2147483648, %v1921_v39 }
 0x134   : > { %v1552_v36 = vpop.eup %1551  ;;  %v561_v43 = vsel %vm558_vm3, %v560_v40, %v556_v41  ;;  %1563 = vpow2.f32 %v1414_v50  ;;  %vm573_vm0 = vcmp.eq.f32.partialorder %v572_v9, 8.507059e+37 }
 0x135   : > { %v534_v42 = vmul.f32 %v1552_v36, %v1912_v28  ;;  %v1927_v49 = vpop.eup %1553  ;;  %vm539_vm5 = vweird.f32 %v1552_v36  ;;  %v575_v47 = vor.u32 1.1754944e-38, %v574_v33  ;;  %v193_v33 = vld [vmem:[%s1657_s18 + $0x28] sm:$0xff] }
 0x136   : > { %v1556_v38 = vpop.eup %1555  ;;  %v609_v46 = vmul.f32 %v1927_v49, %v1915_v18  ;;  %vm1944_vm7 = vmor %vm538_vm4, %vm539_vm5  ;;  %vm614_vm10 = vweird.f32 %v1927_v49 }
 0x137   : > { %v535_v48 = vsub.f32 1.0, %v534_v42  ;;  %v1558_v51 = vpop.eup %1557  ;;  %v1933_v53 = vadd.f32 1.0, %v1556_v38  ;;  %vm1972_vm11 = vmor %vm613_vm9, %vm614_vm10 }
 0x138   : > { %v1936_v44 = vpop.eup %1559  ;;  %v1938_v55 = vadd.f32 1.0, %v1558_v51  ;;  %v610_v58 = vsub.f32 1.0, %v609_v46 }
 0x139   : > { %722 = vrot.lane.b32.xlu1 %v1536_v60, %s1620_s30  ;;  %728 = vrot.lane.b32.xlu2 %v1538_v63, %s1620_s30  ;;  %v536_v52 = vmul.f32 %v1552_v36, %v535_v48  ;;  %1565 = vrcp.f32 %v1933_v53  ;;  %v564_v61 = vmul.f32 %v1936_v44, %v1921_v39  ;;  %v1562_v1 = vpop.eup %1561  ;;  %vm569_vm14 = vweird.f32 %v1936_v44 }
 0x13a   : > { %790 = vrot.lane.b32.xlu0 %v753_v6, %s1621_s4  ;;  %1567 = vrcp.f32 %v1938_v55  ;;  %v1564_v4 = vpop.eup %1563  ;;  %v545_v6 = vor.u32 1.1754944e-38, %v544_v56  ;;  %v611_v7 = vmul.f32 %v1927_v49, %v610_v58  ;;  %vm1997_vm15 = vmor %vm568_vm13, %vm569_vm14  ;;  %vm628_vm1 = vweird.f32 %v1933_v53 }
 0x13b   : > { %v537_v60 = vadd.f32 %v1552_v36, %v536_v52  ;;  %1569 = vpow2.f32 %v1415_v2  ;;  %v634_v50 = vand.u32 2147483648, %v1933_v53  ;;  %vm583_vm3 = vweird.f32 %v1938_v55  ;;  %v191_v52 = vld [vmem:[%s1657_s18 + $0x18] sm:$0xff] }
 0x13c   : > { %v612_v19 = vadd.f32 %v1927_v49, %v611_v7  ;;  %v632_v51 = vand.u32 2147483647, %v1933_v53 }
 0x13d   : > { %v541_v8 = vsel %vm1944_vm7, %v1552_v36, %v537_v60 }
 0x13e   : > { %v713_v12 = vpop.permute.xlu1 %712  ;;  %v546_v5 = vsel %vm543_vm8, %v545_v6, %v541_v8  ;;  %v616_v29 = vsel %vm1972_vm11, %v1927_v49, %v612_v19  ;;  %vm633_vm8 = vcmp.eq.f32.partialorder %v632_v51, 8.507059e+37 }
 0x13f   : > { %v754_v13 = vadd.f32 %v713_v12, %v531_v20  ;;  %v189_v20 = vld [vmem:[%s1657_s18 + $0x8] sm:$0xff]  ;;  %v565_v12 = vsub.f32 1.0, %v564_v61  ;;  %v1963_v3 = vpop.eup %1565  ;;  %v621_v35 = vsel %vm618_vm12, %v620_v26, %v616_v29 }
 0x140   : > { %v1966_v16 = vpop.eup %1567  ;;  %v624_v22 = vmul.f32 %v1963_v3, %v1933_v53  ;;  %vm629_vm2 = vweird.f32 %v1963_v3 }
 0x141   : > { %730 = vrot.lane.b32.xlu1 %v1540_v11, %s1620_s30  ;;  %v1956_v11 = vadd.f32 1.0, %v1562_v1  ;;  %v566_v23 = vmul.f32 %v1936_v44, %v565_v12  ;;  %v579_v27 = vmul.f32 %v1966_v16, %v1938_v55  ;;  %v1570_v28 = vpop.eup %1569  ;;  %vm584_vm4 = vweird.f32 %v1966_v16  ;;  %vm2024_vm5 = vmor %vm628_vm1, %vm629_vm2 }
 0x142   : > { %792 = vrot.lane.b32.xlu0 %v754_v13, %s1621_s4  ;;  %v1959_v13 = vadd.f32 1.0, %v1564_v4  ;;  %v625_v18 = vsub.f32 1.0, %v624_v22  ;;  %v1995_v10 = vadd.f32 1.0, %v1570_v28  ;;  %vm2032_vm7 = vmor %vm583_vm3, %vm584_vm4  ;;  %v635_v1 = vor.u32 1.1754944e-38, %v634_v50 }
 0x143   : > { %1571 = vrcp.f32 %v1956_v11  ;;  %v580_v40 = vsub.f32 1.0, %v579_v27  ;;  %vm598_vm12 = vweird.f32 %v1956_v11  ;;  %v602_v27 = vand.u32 2147483647, %v1956_v11 }
 0x144   : > { %1573 = vrcp.f32 %v1959_v13  ;;  %vm643_vm10 = vweird.f32 %v1959_v13  ;;  %v649_v14 = vand.u32 2147483648, %v1959_v13  ;;  %vm658_vm2 = vweird.f32 %v1995_v10 }
 0x145   : > { %1575 = vrcp.f32 %v1995_v10  ;;  %v581_v48 = vmul.f32 %v1966_v16, %v580_v40  ;;  %vm603_vm1 = vcmp.eq.f32.partialorder %v602_v27, 8.507059e+37  ;;  %v664_v40 = vand.u32 2147483648, %v1995_v10 }
 0x147   : > { %v582_v58 = vadd.f32 %v1966_v16, %v581_v48  ;;  %v194_v48 = vld [vmem:[%s1657_s18 + $0x30] sm:$0xff] }
 0x149   : > { %v1993_v34 = vpop.eup %1571  ;;  %v586_v8 = vsel %vm2032_vm7, %v1966_v16, %v582_v58 }
 0x14a   : > { %v2001_v41 = vpop.eup %1573  ;;  %v594_v49 = vmul.f32 %v1993_v34, %v1956_v11  ;;  %vm599_vm13 = vweird.f32 %v1993_v34 }
 0x14b   : > { %v2036_v61 = vpop.eup %1575  ;;  %vm644_vm11 = vweird.f32 %v2001_v41 }
 0x14c   : > { %v595_v60 = vsub.f32 1.0, %v594_v49  ;;  %v654_v12 = vmul.f32 %v2036_v61, %v1995_v10  ;;  %vm2060_vm14 = vmor %vm643_vm10, %vm644_vm11  ;;  %vm659_vm3 = vweird.f32 %v2036_v61  ;;  %vm1189_vm10 = vcmask 64512  }
 0x14d   : > { %vm660_vm4 = vmor %vm658_vm2, %vm659_vm3 }
 0x14e   : > { %v655_v28 = vsub.f32 1.0, %v654_v12 }
 0x173   : > { %v1917_v32 = vpop.permute.xlu2 %782 }
 0x174   : > { %v829_v17 = vmul.f32 %v1917_v32, %v189_v20  ;;  %v567_v32 = vadd.f32 %v1936_v44, %v566_v23  ;;  %v596_v20 = vmul.f32 %v1993_v34, %v595_v60 }
 0x176   : > { %v571_v39 = vsel %vm1997_vm15, %v1936_v44, %v567_v32  ;;  %v597_v0 = vadd.f32 %v1993_v34, %v596_v20  ;;  %vm2065_vm15 = vmor %vm598_vm12, %vm599_vm13  ;;  %v656_v32 = vmul.f32 %v2036_v61, %v655_v28  ;;  %v200_v44 = vld [vmem:[%s1657_s18 + $0x60] sm:$0xff] }
 0x177   : > { %v576_v46 = vsel %vm573_vm0, %v575_v47, %v571_v39  ;;  %v665_v47 = vor.u32 1.1754944e-38, %v664_v40 }
 0x17b   : > { %v717_v25 = vpop.permute.xlu2 %716 }
 0x17c   : > { %v756_v24 = vadd.f32 %v717_v25, %v561_v43  ;;  %v626_v25 = vmul.f32 %v1963_v3, %v625_v18 }
 0x17e   : > { %796 = vrot.lane.b32.xlu0 %v756_v24, %s1621_s4  ;;  %v639_v24 = vmul.f32 %v2001_v41, %v1959_v13  ;;  %v627_v38 = vadd.f32 %v1963_v3, %v626_v25  ;;  %v662_v25 = vand.u32 2147483647, %v1995_v10 }
 0x180   : > { %v631_v4 = vsel %vm2024_vm5, %v1963_v3, %v627_v38  ;;  %vm663_vm5 = vcmp.eq.f32.partialorder %v662_v25, 8.507059e+37 }
 0x181   : > { %v636_v3 = vsel %vm633_vm8, %v635_v1, %v631_v4  ;;  %v201_v4 = vld [vmem:[%s1657_s18 + $0x68] sm:$0xff] }
 0x183   : > { %v781_v45 = vpop.permute.xlu0 %780  ;;  %v725_v30 = vpop.permute.xlu2 %724 }
 0x184   : > { %v828_v59 = vmul.f32 %v781_v45, %v188_v54  ;;  %v760_v42 = vadd.f32 %v725_v30, %v621_v35  ;;  %v589_v54 = vand.u32 2147483648, %v1938_v55  ;;  %v640_v45 = vsub.f32 1.0, %v639_v24 }
 0x186   : > { %1432 = vmatmul.msk.f32.vlgmr.msra.gmra.mxu2 %vm958_vm6, %v828_v59  ;;  %v587_v59 = vand.u32 2147483647, %v1938_v55  ;;  %v590_v6 = vor.u32 1.1754944e-38, %v589_v54  ;;  %v641_v55 = vmul.f32 %v2001_v41, %v640_v45  ;;  %v196_v45 = vld [vmem:[%s1657_s18 + $0x40] sm:$0xff] }
 0x188   : > { %vm588_vm9 = vcmp.eq.f32.partialorder %v587_v59, 8.507059e+37  ;;  %v642_v16 = vadd.f32 %v2001_v41, %v641_v55 }
 0x18b   : > { %v715_v15 = vpop.permute.xlu0 %714  ;;  %v727_v7 = vpop.permute.xlu2 %726 }
 0x18c   : > { %v755_v57 = vadd.f32 %v715_v15, %v546_v5  ;;  %v591_v5 = vsel %vm588_vm9, %v590_v6, %v586_v8  ;;  %v192_v15 = vld [vmem:[%s1657_s18 + $0x20] sm:$0xff]  ;;  %v761_v21 = vadd.f32 %v727_v7, %v636_v3  ;;  %v198_v6 = vld [vmem:[%s1657_s18 + $0x50] sm:$0xff]  ;;  %v199_v3 = vld [vmem:[%s1657_s18 + $0x58] sm:$0xff] }
 0x18e   : > { %794 = vrot.lane.b32.xlu2 %v755_v57, %s1621_s4  ;;  %1433 = vmatmul.msk.f32.gmra.mxu2 %vm958_vm6, %v829_v17  ;;  %v647_v17 = vand.u32 2147483647, %v1959_v13  ;;  %v604_v57 = vand.u32 2147483648, %v1956_v11  ;;  %v646_v13 = vsel %vm2060_vm14, %v2001_v41, %v642_v16  ;;  %v601_v11 = vsel %vm2065_vm15, %v1993_v34, %v597_v0 }
 0x18f   : > { %v657_v34 = vadd.f32 %v2036_v61, %v656_v32 }
 0x190   : > { %v605_v18 = vor.u32 1.1754944e-38, %v604_v57  ;;  %vm648_vm0 = vcmp.eq.f32.partialorder %v647_v17, 8.507059e+37  ;;  %v203_v17 = vld [vmem:[%s1657_s18 + $0x78] sm:$0xff] }
 0x191   : > { %v661_v24 = vsel %vm660_vm4, %v2036_v61, %v657_v34  ;;  %v197_v61 = vld [vmem:[%s1657_s18 + $0x48] sm:$0xff] }
 0x192   : > { %v666_v49 = vsel %vm663_vm5, %v665_v47, %v661_v24 }
 0x193   : > { %v785_v36 = vpop.permute.xlu1 %784  ;;  %v729_v9 = vpop.permute.xlu2 %728 }
 0x194   : > { %v830_v43 = vmul.f32 %v785_v36, %v190_v31  ;;  %v650_v31 = vor.u32 1.1754944e-38, %v649_v14  ;;  %v606_v36 = vsel %vm603_vm1, %v605_v18, %v601_v11  ;;  %v202_v14 = vld [vmem:[%s1657_s18 + $0x70] sm:$0xff]  ;;  %v1089_v11 = vlaneseq }
 0x196   : > { %804 = vrot.lane.b32.xlu2 %v760_v42, %s1621_s4  ;;  %1434 = vmatmul.msk.f32.gmra.mxu2 %vm958_vm6, %v830_v43  ;;  %v651_v35 = vsel %vm648_vm0, %v650_v31, %v646_v13  ;;  %v2110_v13 = vpop.f32.mrf.mxu3 }
 0x197   : > { %v762_v41 = vadd.f32 %v729_v9, %v651_v35  ;;  %v2114_v9 = vshrl.u32 %v1089_v11, 7 }
 0x199   : > { %v1092_v40 = vadd.s32 16, %v2114_v9 }
 0x19b   : > { %v719_v56 = vpop.permute.xlu1 %718 }
 0x19c   : > { %v757_v62 = vadd.f32 %v719_v56, %v576_v46  ;;  %v787_v63 = vpop.permute.xlu0 %786  ;;  %v195_v46 = vld [vmem:[%s1657_s18 + $0x38] sm:$0xff] }
 0x19d   : > { %v831_v2 = vmul.f32 %v787_v63, %v191_v52 }
 0x19e   : > { %798 = vrot.lane.b32.xlu1 %v757_v62, %s1621_s4  ;;  %v910_v62 = vpop.f32.mrf.mxu1  ;;  %v2112_v32 = vpop.f32.mrf.mxu3 }
 0x19f   : > { %1435 = vmatmul.msk.f32.gmra.mxu2 %vm958_vm6, %v831_v2 }
 0x1a3   : > { %v721_v19 = vpop.permute.xlu1 %720 }
 0x1a4   : > { %v758_v23 = vadd.f32 %v721_v19, %v591_v5  ;;  %v789_v26 = vpop.permute.xlu0 %788 }
 0x1a5   : > { %v832_v29 = vmul.f32 %v789_v26, %v192_v15 }
 0x1a6   : > { %806 = vrot.lane.b32.xlu1 %v761_v21, %s1621_s4  ;;  %800 = vrot.lane.b32.xlu0 %v758_v23, %s1621_s4  ;;  %v913_v57 = vpop.f32.mrf.mxu1 }
 0x1a7   : > { %1436 = vmatmul.msk.f32.gmra.mxu2 %vm958_vm6, %v832_v29 }
 0x1ab   : > { %v723_v37 = vpop.permute.xlu1 %722 }
 0x1ac   : > { %v759_v42 = vadd.f32 %v723_v37, %v606_v36  ;;  %v791_v43 = vpop.permute.xlu0 %790  ;;  %v2120_v37 = vstv %s1448_s15 }
 0x1ad   : > { %v833_v39 = vmul.f32 %v791_v43, %v193_v33  ;;  %v1091_v33 = vadd.s32 8, %v2114_v9  ;;  %v1108_v34 = vadd.s32 %v2120_v37, %v2114_v9  ;;  %v1110_v47 = vadd.s32 %v2120_v37, %v1092_v40 }
 0x1ae   : > { %808 = vrot.lane.b32.xlu0 %v762_v41, %s1621_s4  ;;  %802 = vrot.lane.b32.xlu2 %v759_v42, %s1621_s4  ;;  %v916_v22 = vpop.f32.mrf.mxu1  ;;  %v2126_v42 = vld [vmem:[%s2236_s2 + $0x40] ss:$0 sm:$0xff] }
 0x1af   : > { %1437 = vmatmul.msk.f32.gmra.mxu2 %vm958_vm6, %v833_v39  ;;  %v1109_v43 = vadd.s32 %v2120_v37, %v1091_v33  ;;  %v1093_v39 = vadd.s32 24, %v2114_v9  ;;  %vm1124_vm7 = vcmp.lt.s32.totalorder %v1108_v34, 300  ;;  %vm1126_vm8 = vcmp.lt.s32.totalorder %v1110_v47, 300 }
 0x1b3   : > { %v731_v50 = vpop.permute.xlu1 %730 }
 0x1b4   : > { %v763_v38 = vadd.f32 %v731_v50, %v666_v49  ;;  %v793_v10 = vpop.permute.xlu0 %792 }
 0x1b5   : > { %v834_v51 = vmul.f32 %v793_v10, %v194_v48  ;;  %v2134_v48 = vpop.f32.mrf.mxu3 }
 0x1b6   : > { %810 = vrot.lane.b32.xlu1 %v763_v38, %s1621_s4  ;;  %v919_v26 = vpop.f32.mrf.mxu1 }
 0x1b7   : > { %1438 = vmatmul.msk.f32.gmra.mxu2 %vm958_vm6, %v834_v51  ;;  %v1111_v51 = vadd.s32 %v2120_v37, %v1093_v39  ;;  %v1099_v39 = vadd.s32 72, %v2114_v9 }
 0x1b9   : > { %vm1127_vm9 = vcmp.lt.s32.totalorder %v1111_v51, 300 }
 0x1be   : > { %v922_v28 = vpop.f32.mrf.mxu1 }
 0x1c6   : > { %v925_v30 = vpop.f32.mrf.mxu1 }
 0x1ce   : > { %v928_v18 = vpop.f32.mrf.mxu1 }
 0x1d6   : > { %v2118_v36 = vpop.f32.mrf.mxu1 }
 0x1e8   : > { %v795_v52 = vpop.permute.xlu2 %794 }
 0x1e9   : > { %v835_v54 = vmul.f32 %v795_v52, %v195_v46  ;;  %v1094_v46 = vadd.s32 32, %v2114_v9  ;;  %v934_v52 = vpop.f32.mrf.mxu1 }
 0x1eb   : > { %1439 = vmatmul.msk.f32.gmra.mxu2 %vm958_vm6, %v835_v54 }
 0x1f0   : > { %v805_v56 = vpop.permute.xlu2 %804  ;;  %v797_v58 = vpop.permute.xlu0 %796 }
 0x1f1   : > { %v840_v59 = vmul.f32 %v805_v56, %v200_v44  ;;  %v836_v60 = vmul.f32 %v797_v58, %v196_v45 }
 0x1f3   : > { %1440 = vmatmul.msk.f32.gmra.mxu2 %vm958_vm6, %v836_v60  ;;  %1444 = vmatmul.msk.f32.vlgmr.msra.gmra.mxu3 %vm958_vm6, %v840_v59  ;;  %v1095_v59 = vadd.s32 40, %v2114_v9 }
 0x208   : > { %v803_v12 = vpop.permute.xlu2 %802 }
 0x209   : > { %v1024_v63 = vpop.f32.mrf.mxu2  ;;  %v839_v15 = vmul.f32 %v803_v12, %v199_v3 }
 0x20a   : > { %v1025_v53 = vadd.f32 %v1024_v63, %v910_v62  ;;  %v1112_v62 = vadd.s32 %v2120_v37, %v1094_v46  ;;  %v1096_v63 = vadd.s32 48, %v2114_v9 }
 0x20c   : > { %v1073_v49 = vadd.f32 %v2126_v42, %v1025_v53  ;;  %vm1128_vm11 = vcmp.lt.s32.totalorder %v1112_v62, 300  ;;  %v1114_v12 = vadd.s32 %v2120_v37, %v1096_v63 }
 0x20e   : > { %v1172_v44 = vsel %vm1124_vm7, %v1073_v49, 0.0  ;;  %vm1130_vm13 = vcmp.lt.s32.totalorder %v1114_v12, 300  ;;  %vm1228_vm7 = vcmask 57344  }
 0x20f   : > { %v1231_v53 = vmul.f32 %v1172_v44, %v1172_v44 }
 0x210   : > { %v799_v1 = vpop.permute.xlu1 %798 }
 0x211   : > { %v837_v2 = vmul.f32 %v799_v1, %v197_v61  ;;  %v1027_v21 = vpop.f32.mrf.mxu2 }
 0x212   : > { %v1028_v41 = vadd.f32 %v1027_v21, %v913_v57  ;;  %v1097_v57 = vadd.s32 56, %v2114_v9  ;;  %v937_v21 = vpop.f32.mrf.mxu1 }
 0x213   : > { %1441 = vmatmul.msk.f32.gmra.mxu2 %vm958_vm6, %v837_v2 }
 0x214   : > { %v1074_v24 = vadd.f32 %v2126_v42, %v1028_v41  ;;  %v1115_v33 = vadd.s32 %v2120_v37, %v1097_v57 }
 0x216   : > { %vm1131_vm14 = vcmp.lt.s32.totalorder %v1115_v33, 300 }
 0x218   : > { %v807_v7 = vpop.permute.xlu1 %806  ;;  %v801_v55 = vpop.permute.xlu0 %800 }
 0x219   : > { %v841_v8 = vmul.f32 %v807_v7, %v201_v4  ;;  %v838_v20 = vmul.f32 %v801_v55, %v198_v6  ;;  %v1030_v23 = vpop.f32.mrf.mxu2  ;;  %v1113_v7 = vadd.s32 %v2120_v37, %v1095_v59  ;;  %v2147_v55 = vpop.f32.mrf.mxu3 }
 0x21a   : > { %v1031_v25 = vadd.f32 %v1030_v23, %v916_v22 }
 0x21b   : > { %1442 = vmatmul.msk.f32.gmra.mxu2 %vm958_vm6, %v838_v20  ;;  %1445 = vmatmul.msk.f32.gmra.mxu3 %vm958_vm6, %v841_v8  ;;  %vm1129_vm12 = vcmp.lt.s32.totalorder %v1113_v7, 300 }
 0x21c   : > { %v1075_v10 = vadd.f32 %v2126_v42, %v1031_v25 }
 0x21e   : > { %v1174_v56 = vsel %vm1126_vm8, %v1075_v10, 0.0  ;;  %v1100_v10 = vadd.s32 80, %v2114_v9 }
 0x21f   : > { %v1233_v61 = vmul.f32 %v1174_v56, %v1174_v56 }
 0x220   : > { %v809_v5 = vpop.permute.xlu0 %808 }
 0x221   : > { %v842_v16 = vmul.f32 %v809_v5, %v202_v14  ;;  %v1190_v14 = vsel %vm1189_vm10, %v1172_v44, 0.0  ;;  %v1247_v5 = vsel %vm1189_vm10, %v1231_v53, 0.0 }
 0x222   : > { %v1033_v27 = vpop.f32.mrf.mxu2 }
 0x223   : > { %1443 = vmatmul.msk.f32.gmra.mxu2 %vm958_vm6, %v839_v15  ;;  %1446 = vmatmul.msk.f32.gmra.mxu3 %vm958_vm6, %v842_v16  ;;  %v1034_v50 = vadd.f32 %v1033_v27, %v919_v26  ;;  %v1193_v15 = vsel %vm1189_vm10, %v1174_v56, 0.0  ;;  %v1117_v56 = vadd.s32 %v2120_v37, %v1099_v39 }
 0x225   : > { %v1076_v45 = vadd.f32 %v2126_v42, %v1034_v50  ;;  %vm1133_vm0 = vcmp.lt.s32.totalorder %v1117_v56, 300 }
 0x227   : > { %v1175_v1 = vsel %vm1127_vm9, %v1076_v45, 0.0 }
 0x228   : > { %v811_v19 = vpop.permute.xlu1 %810  ;;  %v1234_v16 = vmul.f32 %v1175_v1, %v1175_v1 }
 0x229   : > { %v843_v0 = vmul.f32 %v811_v19, %v203_v17  ;;  %v1250_v19 = vsel %vm1189_vm10, %v1233_v61, 0.0  ;;  %v1118_v61 = vadd.s32 %v2120_v37, %v1100_v10 }
 0x22a   : > { %v1036_v29 = vpop.f32.mrf.mxu2 }
 0x22b   : > { %1447 = vmatmul.msk.f32.gmra.mxu3 %vm958_vm6, %v843_v0  ;;  %vm1125_vm6 = vcmp.lt.s32.totalorder %v1109_v43, 300  ;;  %v1037_v58 = vadd.f32 %v1036_v29, %v922_v28  ;;  %v1195_v29 = vsel %vm1189_vm10, %v1175_v1, 0.0  ;;  %vm1134_vm1 = vcmp.lt.s32.totalorder %v1118_v61, 300 }
 0x22c   : > { %v1173_v54 = vsel %vm1125_vm6, %v1074_v24, 0.0 }
 0x22d   : > { %v1232_v60 = vmul.f32 %v1173_v54, %v1173_v54  ;;  %v1191_v4 = vsel %vm1189_vm10, %v1173_v54, 0.0  ;;  %v1077_v6 = vadd.f32 %v2126_v42, %v1037_v58  ;;  %v1102_v54 = vadd.s32 96, %v2114_v9  ;;  %v940_v58 = vpop.f32.mrf.mxu1 }
 0x22e   : > { %v1192_v17 = vadd.f32 %v1191_v4, %v1190_v14 }
 0x22f   : > { %v1248_v8 = vsel %vm1189_vm10, %v1232_v60, 0.0  ;;  %v1176_v23 = vsel %vm1128_vm11, %v1077_v6, 0.0  ;;  %v1120_v4 = vadd.s32 %v2120_v37, %v1102_v54 }
 0x230   : > { %v1249_v22 = vadd.f32 %v1248_v8, %v1247_v5  ;;  %v1194_v26 = vadd.f32 %v1193_v15, %v1192_v17  ;;  %v1197_v47 = vsel %vm1189_vm10, %v1176_v23, 0.0  ;;  %v1103_v15 = vadd.s32 104, %v2114_v9 }
 0x231   : > { %vm1136_vm2 = vcmp.lt.s32.totalorder %v1120_v4, 300 }
 0x232   : > { %v1039_v31 = vpop.f32.mrf.mxu2  ;;  %v1251_v28 = vadd.f32 %v1250_v19, %v1249_v22  ;;  %v1196_v40 = vadd.f32 %v1195_v29, %v1194_v26  ;;  %v1104_v26 = vadd.s32 112, %v2114_v9 }
 0x233   : > { %v1040_v2 = vadd.f32 %v1039_v31, %v925_v30  ;;  %v1252_v30 = vsel %vm1189_vm10, %v1234_v16, 0.0 }
 0x234   : > { %v1253_v41 = vadd.f32 %v1252_v30, %v1251_v28  ;;  %v1198_v45 = vadd.f32 %v1197_v47, %v1196_v40  ;;  %v1121_v30 = vadd.s32 %v2120_v37, %v1103_v15  ;;  %v1122_v47 = vadd.s32 %v2120_v37, %v1104_v26 }
 0x235   : > { %v1078_v0 = vadd.f32 %v2126_v42, %v1040_v2 }
 0x236   : > { %vm1137_vm3 = vcmp.lt.s32.totalorder %v1121_v30, 300  ;;  %vm1138_vm5 = vcmp.lt.s32.totalorder %v1122_v47, 300 }
 0x237   : > { %v1177_v11 = vsel %vm1129_vm12, %v1078_v0, 0.0 }
 0x238   : > { %v1236_v24 = vmul.f32 %v1177_v11, %v1177_v11  ;;  %v1199_v51 = vsel %vm1189_vm10, %v1177_v11, 0.0  ;;  %v943_v11 = vpop.f32.mrf.mxu1 }
 0x239   : > { %v1200_v63 = vadd.f32 %v1199_v51, %v1198_v45 }
 0x23a   : > { %v1042_v35 = vpop.f32.mrf.mxu2 }
 0x23b   : > { %v1043_v20 = vadd.f32 %v1042_v35, %v928_v18  ;;  %v1235_v18 = vmul.f32 %v1176_v23, %v1176_v23  ;;  %v1098_v35 = vadd.s32 64, %v2114_v9 }
 0x23d   : > { %v1079_v27 = vadd.f32 %v2126_v42, %v1043_v20 }
 0x23f   : > { %v1178_v43 = vsel %vm1130_vm13, %v1079_v27, 0.0 }
 0x240   : > { %v1237_v46 = vmul.f32 %v1178_v43, %v1178_v43  ;;  %v1201_v53 = vsel %vm1189_vm10, %v1178_v43, 0.0 }
 0x242   : > { %v1258_v1 = vsel %vm1189_vm10, %v1237_v46, 0.0 }
 0x26e   : > { %v1045_v38 = vpop.f32.mrf.mxu2 }
 0x26f   : > { %v1046_v31 = vadd.f32 %v1045_v38, %v2118_v36  ;;  %v1254_v36 = vsel %vm1189_vm10, %v1235_v18, 0.0  ;;  %v1116_v38 = vadd.s32 %v2120_v37, %v1098_v35 }
 0x270   : > { %v1255_v59 = vadd.f32 %v1254_v36, %v1253_v41 }
 0x271   : > { %v1080_v49 = vadd.f32 %v2126_v42, %v1046_v31  ;;  %vm1132_vm15 = vcmp.lt.s32.totalorder %v1116_v38, 300  ;;  %v1105_v38 = vadd.s32 120, %v2114_v9 }
 0x273   : > { %v1179_v60 = vsel %vm1131_vm14, %v1080_v49, 0.0 }
 0x274   : > { %v1238_v8 = vmul.f32 %v1179_v60, %v1179_v60  ;;  %v1203_v17 = vsel %vm1189_vm10, %v1179_v60, 0.0 }
 0x276   : > { %v1048_v3 = vpop.f32.mrf.mxu2  ;;  %v1060_v34 = vpop.f32.mrf.mxu3 }
 0x277   : > { %v1049_v50 = vadd.f32 %v1048_v3, %v934_v52  ;;  %v1256_v52 = vsel %vm1189_vm10, %v1236_v24, 0.0  ;;  %v1061_v2 = vadd.f32 %v1060_v34, %v2110_v13  ;;  %v1202_v3 = vadd.f32 %v1201_v53, %v1200_v63 }
 0x278   : > { %v1257_v7 = vadd.f32 %v1256_v52, %v1255_v59  ;;  %v1101_v13 = vadd.s32 88, %v2114_v9 }
 0x279   : > { %v1081_v62 = vadd.f32 %v2126_v42, %v1049_v50  ;;  %v1085_v19 = vadd.f32 %v2126_v42, %v1061_v2  ;;  %v1204_v27 = vadd.f32 %v1203_v17, %v1202_v3 }
 0x27a   : > { %v1259_v16 = vadd.f32 %v1258_v1, %v1257_v7  ;;  %v1119_v18 = vadd.s32 %v2120_v37, %v1101_v13 }
 0x27b   : > { %v1180_v14 = vsel %vm1132_vm15, %v1081_v62, 0.0  ;;  %v1184_v40 = vsel %vm1136_vm2, %v1085_v19, 0.0  ;;  %v1123_v62 = vadd.s32 %v2120_v37, %v1105_v38 }
 0x27c   : > { %v1205_v22 = vsel %vm1189_vm10, %v1180_v14, 0.0  ;;  %v1239_v23 = vmul.f32 %v1180_v14, %v1180_v14  ;;  %vm1135_vm4 = vcmp.lt.s32.totalorder %v1119_v18, 300  ;;  %v1243_v59 = vmul.f32 %v1184_v40, %v1184_v40 }
 0x27d   : > { %v1206_v35 = vadd.f32 %v1205_v22, %v1204_v27  ;;  %v1213_v61 = vsel %vm1189_vm10, %v1184_v40, 0.0  ;;  %vm1139_vm6 = vcmp.lt.s32.totalorder %v1123_v62, 300 }
 0x27e   : > { %v1262_v41 = vsel %vm1189_vm10, %v1239_v23, 0.0 }
 0x296   : > { %v1051_v25 = vpop.f32.mrf.mxu2 }
 0x297   : > { %v1052_v44 = vadd.f32 %v1051_v25, %v937_v21  ;;  %v1260_v21 = vsel %vm1189_vm10, %v1238_v8, 0.0 }
 0x298   : > { %v1261_v33 = vadd.f32 %v1260_v21, %v1259_v16 }
 0x299   : > { %v1082_v6 = vadd.f32 %v2126_v42, %v1052_v44 }
 0x29a   : > { %v1263_v10 = vadd.f32 %v1262_v41, %v1261_v33 }
 0x29b   : > { %v1181_v0 = vsel %vm1133_vm0, %v1082_v6, 0.0 }
 0x29c   : > { %v1240_v31 = vmul.f32 %v1181_v0, %v1181_v0  ;;  %v1207_v43 = vsel %vm1189_vm10, %v1181_v0, 0.0 }
 0x29d   : > { %v1208_v51 = vadd.f32 %v1207_v43, %v1206_v35  ;;  %v1188_v35 = vld [vmem:[#allocation2] sm:$0x1]  ;;  %v1230_v43 = vld [vmem:[#allocation3] sm:$0x1] }
 0x29e   : > { %v1054_v20 = vpop.f32.mrf.mxu2  ;;  %v1063_v12 = vpop.f32.mrf.mxu3  ;;  %v1264_v50 = vsel %vm1189_vm10, %v1240_v31, 0.0 }
 0x29f   : > { %v1055_v5 = vadd.f32 %v1054_v20, %v940_v58  ;;  %v1064_v29 = vadd.f32 %v1063_v12, %v2112_v32  ;;  %v1265_v45 = vadd.f32 %v1264_v50, %v1263_v10  ;;  %v1270_v20 = vsel %vm1189_vm10, %v1243_v59, 0.0 }
 0x2a1   : > { %v1083_v57 = vadd.f32 %v2126_v42, %v1055_v5  ;;  %v1086_v32 = vadd.f32 %v2126_v42, %v1064_v29 }
 0x2a3   : > { %v1182_v28 = vsel %vm1134_vm1, %v1083_v57, 0.0  ;;  %v1185_v58 = vsel %vm1137_vm3, %v1086_v32, 0.0 }
 0x2a4   : > { %v1241_v34 = vmul.f32 %v1182_v28, %v1182_v28  ;;  %v1209_v36 = vsel %vm1189_vm10, %v1182_v28, 0.0  ;;  %v1244_v1 = vmul.f32 %v1185_v58, %v1185_v58  ;;  %v1215_v12 = vsel %vm1189_vm10, %v1185_v58, 0.0 }
 0x2a5   : > { %v1210_v56 = vadd.f32 %v1209_v36, %v1208_v51 }
 0x2a6   : > { %v1057_v25 = vpop.f32.mrf.mxu2  ;;  %v1066_v39 = vpop.f32.mrf.mxu3  ;;  %v1266_v44 = vsel %vm1189_vm10, %v1241_v34, 0.0  ;;  %v1272_v15 = vsel %vm1189_vm10, %v1244_v1, 0.0 }
 0x2a7   : > { %v1058_v24 = vadd.f32 %v1057_v25, %v943_v11  ;;  %v1067_v49 = vadd.f32 %v1066_v39, %v2134_v48  ;;  %v1267_v9 = vadd.f32 %v1266_v44, %v1265_v45 }
 0x2a9   : > { %v1084_v46 = vadd.f32 %v2126_v42, %v1058_v24  ;;  %v1087_v54 = vadd.f32 %v2126_v42, %v1067_v49 }
 0x2ab   : > { %v1183_v48 = vsel %vm1135_vm4, %v1084_v46, 0.0  ;;  %v1186_v53 = vsel %vm1138_vm5, %v1087_v54, 0.0 }
 0x2ac   : > { %v1211_v52 = vsel %vm1189_vm10, %v1183_v48, 0.0  ;;  %v1242_v60 = vmul.f32 %v1183_v48, %v1183_v48  ;;  %v1245_v3 = vmul.f32 %v1186_v53, %v1186_v53  ;;  %v1217_v16 = vsel %vm1189_vm10, %v1186_v53, 0.0 }
 0x2ad   : > { %v1212_v63 = vadd.f32 %v1211_v52, %v1210_v56 }
 0x2ae   : > { %v1268_v2 = vsel %vm1189_vm10, %v1242_v60, 0.0  ;;  %v1069_v4 = vpop.f32.mrf.mxu3  ;;  %v1274_v0 = vsel %vm1189_vm10, %v1245_v3, 0.0 }
 0x2af   : > { %v1214_v6 = vadd.f32 %v1213_v61, %v1212_v63  ;;  %v1269_v7 = vadd.f32 %v1268_v2, %v1267_v9  ;;  %v1070_v8 = vadd.f32 %v1069_v4, %v2147_v55 }
 0x2b1   : > { %v1271_v37 = vadd.f32 %v1270_v20, %v1269_v7  ;;  %v1216_v14 = vadd.f32 %v1215_v12, %v1214_v6  ;;  %v1088_v5 = vadd.f32 %v2126_v42, %v1070_v8 }
 0x2b3   : > { %v1218_v17 = vadd.f32 %v1217_v16, %v1216_v14  ;;  %v1273_v13 = vadd.f32 %v1272_v15, %v1271_v37  ;;  %v1187_v19 = vsel %vm1139_vm6, %v1088_v5, 0.0 }
 0x2b4   : > { %v1219_v55 = vsel %vm1189_vm10, %v1187_v19, 0.0  ;;  %v1246_v57 = vmul.f32 %v1187_v19, %v1187_v19 }
 0x2b5   : > { %v1275_v21 = vadd.f32 %v1274_v0, %v1273_v13  ;;  %v1220_v22 = vadd.f32 %v1219_v55, %v1218_v17 }
 0x2b6   : > { %v1276_v23 = vsel %vm1189_vm10, %v1246_v57, 0.0 }
 0x2b7   : > { %v1221_v26 = vrot.slane %v1220_v22, 4  ;;  %v1277_v27 = vadd.f32 %v1276_v23, %v1275_v21 }
 0x2b9   : > { %v1222_v28 = vadd.f32 %v1221_v26, %v1220_v22  ;;  %v1278_v42 = vrot.slane %v1277_v27, 4 }
 0x2bb   : > { %v1223_v29 = vrot.slane %v1222_v28, 2  ;;  %v1279_v30 = vadd.f32 %v1278_v42, %v1277_v27 }
 0x2bd   : > { %v1224_v31 = vadd.f32 %v1223_v29, %v1222_v28  ;;  %v1280_v18 = vrot.slane %v1279_v30, 2 }
 0x2bf   : > { %v1225_v11 = vrot.slane %v1224_v31, 1  ;;  %v1281_v33 = vadd.f32 %v1280_v18, %v1279_v30 }
 0x2c1   : > { %v1226_v40 = vadd.f32 %v1225_v11, %v1224_v31  ;;  %v1282_v41 = vrot.slane %v1281_v33, 1 }
 0x2c3   : > { %v1227_v34 = vadd.f32 %v1226_v40, %v1188_v35  ;;  %v1283_v25 = vadd.f32 %v1282_v41, %v1281_v33  ;;  %1289 = sbr.rel (%p1449_p5) target bundleno = 750 (0x2ee), region = 40 }
 0x2c5   : > { %1229 = vst.msk [vmem:[#allocation2] sm:$0x1] %vm1228_vm7, %v1227_v34  ;;  %v1284_v39 = vadd.f32 %v1283_v25, %v1230_v43 }
 0x2c7   : > { %1285 = vst.msk [vmem:[#allocation3] sm:$0x1] %vm1228_vm7, %v1284_v39 }
 0x2c8   : > { %v1290_v45 = vld [vmem:[%s2236_s2 + $0x48] sm:$0x1]  ;;  %v1291_v59 = vld [vmem:[%s2236_s2 + $0x50] sm:$0x1] }
 0x2cc   : > { %v1292_v47 = vld [vmem:[#allocation2] sm:$0x1] }
 0x2cd   : > { %v1293_v24 = vmul.f32 0.0033333334, %v1292_v47 }
 0x2ce   : > { %v1294_v32 = vld [vmem:[#allocation3] sm:$0x1] }
 0x2cf   : > { %v1295_v49 = vmul.f32 0.0033333334, %v1294_v32  ;;  %v1296_v50 = vmul.f32 %v1293_v24, %v1293_v24 }
 0x2d1   : > { %v1297_v36 = vsub.f32 %v1295_v49, %v1296_v50 }
 0x2d3   : > { %v1298_v38 = vadd.f32 1e-05, %v1297_v36 }
 0x2d5   : > { %1577 = vrsqrt.f32 %v1298_v38  ;;  %vm1305_vm8 = vweird.f32 %v1298_v38 }
 0x2db   : > { %v1578_v10 = vpop.eup %1577 }
 0x2dc   : > { %v1300_v51 = vmul.f32 %v1578_v10, %v1298_v38  ;;  %vm1306_vm9 = vweird.f32 %v1578_v10 }
 0x2dd   : > { %vm1307_vm10 = vmor %vm1305_vm8, %vm1306_vm9 }
 0x2de   : > { %v1301_v46 = vmul.f32 %v1578_v10, %v1300_v51 }
 0x2e0   : > { %v1302_v54 = vmul.f32 0.5, %v1301_v46 }
 0x2e2   : > { %v1303_v44 = vsub.f32 1.5, %v1302_v54 }
 0x2e4   : > { %v1304_v56 = vmul.f32 %v1578_v10, %v1303_v44 }
 0x2e6   : > { %v1308_v58 = vsel %vm1307_vm10, %v1578_v10, %v1304_v56 }
 0x2e7   : > { %v1309_v48 = vmul.f32 %v1308_v58, %v1290_v45 }
 0x2e9   : > { %1312 = vst.msk [vmem:[#allocation4] sm:$0x1] %vm1228_vm7, %v1309_v48  ;;  %v1310_v52 = vmul.f32 %v1309_v48, %v1293_v24 }
 0x2eb   : > { %v1311_v60 = vsub.f32 %v1291_v59, %v1310_v52 }
 0x2ed   : > { %1313 = vst.msk [vmem:[#allocation4 + $0x1] sm:$0x1] %vm1228_vm7, %v1311_v60 }
 0x2ee PF: > { %p1465_p6 = scmp.eq.s32.totalorder %s1649_s13, 2  ;;  %s1622_s22 = smov [#allocation4]  }
 0x2ef   : > { %s1320_s23 = sshll.u32 %s1622_s22, 4  ;;  %s1322_s26 = sshll.u32 %s2237_s3, 4  ;;  %s1321_s23 = int_to_ptr.vmem [resolvable:$true] %s1320_s23  ;;  %s1323_s26 = int_to_ptr.hbm [resolvable:$true] %s1322_s26 }
 0x2f0   : > { %1462 = dma.vmem_to_hbm [thread:$0]  (%p1465_p6), %s1321_s23, 32, %s1323_s26, [#allocation5]  }
 0x2f1   : > { %1612 = dma.done.wait (%p1465_p6), [#allocation5], 32  }
 0x2f2   : > { %1614 = vsyncadd (%p1465_p6), [#allocation5], 4294967264 }
 0x2f3 PF: > { %s14_s12 = sadd.s32 1, %s1617_s12  }
 0x2f4   : > { %p11_p7 = scmp.ge.s32.totalorder %s14_s12, 5  }
 0x2f6   :  { %13 = sbr.rel (!%p11_p7) target bundleno = 1 (0x1), region = 70 }
 0x2fb   :  { %1336 = vsyncpa [#allocation5], 1 }
 0x2fc   :  { %1338 = vsyncpa [#allocation5 + $0x1], 1 }

</bundles_post_ra>
